<compile_context>
chip_gen: v7x
topology: tpu7x:2x2x1
jax: 0.10.0
libtpu: 0.0.40
codegen_flags: <defaults>
</compile_context>

<pallas_src>
import functools
import math

import jax
import jax.numpy as jnp
import numpy as np
from jax import lax
from jax.experimental import pallas as pl
from jax.experimental.pallas import tpu as pltpu

LANE = 128
NEG_BIG = -1e30  # fill for padded / masked feature columns before max / exp


# ----------------------------------------------------------------------------
# Deterministic parameter init: gaussian orthogonal random matrix (Performer).
# ----------------------------------------------------------------------------
def gaussian_orthogonal_random_matrix(key, nb_rows, nb_columns, scaling=0):
    nb_full_blocks = nb_rows // nb_columns
    keys = jax.random.split(key, nb_full_blocks + 2)
    blocks = []
    for i in range(nb_full_blocks):
        unstructured = jax.random.normal(keys[i], (nb_columns, nb_columns), jnp.float32)
        q, _ = jnp.linalg.qr(unstructured)
        blocks.append(q.T)
    remaining = nb_rows - nb_full_blocks * nb_columns
    if remaining > 0:
        unstructured = jax.random.normal(
            keys[nb_full_blocks], (nb_columns, nb_columns), jnp.float32
        )
        q, _ = jnp.linalg.qr(unstructured)
        blocks.append(q.T[:remaining])
    final_matrix = jnp.concatenate(blocks, axis=0)

    if scaling == 0:
        multiplier = jnp.linalg.norm(
            jax.random.normal(keys[-1], (nb_rows, nb_columns), jnp.float32), axis=1
        )
    elif scaling == 1:
        multiplier = math.sqrt(float(nb_columns)) * jnp.ones((nb_rows,), jnp.float32)
    else:
        raise ValueError(f"Invalid scaling {scaling}")
    return multiplier[:, None] * final_matrix


# ----------------------------------------------------------------------------
# Pass 1: per-head max of k_dash (Performer global key stabilizer).
# One grid step == one head.  Same bf16 matmul precision as the main kernel.
# ----------------------------------------------------------------------------
def _k_stabilizer_kernel(k_ref, proj_ref, max_ref, *, m_real):
    N = k_ref.shape[1]
    D = k_ref.shape[2]
    M_pad = proj_ref.shape[0]
    data_normalizer = float(D) ** -0.25

    proj_b = (proj_ref[...] * data_normalizer).astype(jnp.bfloat16)        # (M_pad, D)
    k_b = k_ref[0].astype(jnp.bfloat16)                                    # (N, D)
    k_dash = lax.dot_general(k_b, proj_b, (((1,), (1,)), ((), ())),
                             preferred_element_type=jnp.float32)           # (N, M_pad)
    col = lax.broadcasted_iota(jnp.int32, (N, M_pad), 1)
    k_dash = jnp.where(col < m_real, k_dash, NEG_BIG)
    # Broadcast the per-head scalar into a fully (8, 128)-aligned output tile.
    max_ref[0] = jnp.full((8, LANE), jnp.max(k_dash), dtype=jnp.float32)


# ----------------------------------------------------------------------------
# Pass 2: main attention kernel.  One grid step == (head, query-block).
# ----------------------------------------------------------------------------
def _fast_attention_kernel(stab_ref, q_ref, k_ref, v_ref, proj_ref,
                           align_ref, *rest, m_real, compute_weights):
    if compute_weights:
        w_ref, kp_ref, ctx_ref, kcs_ref = rest
    else:
        w_ref, kp_ref = None, None
        ctx_ref, kcs_ref = rest

    N = k_ref.shape[1]          # full sequence length (keys/values)
    TQ = q_ref.shape[1]         # query tile
    D = q_ref.shape[2]
    M_pad = proj_ref.shape[0]

    data_normalizer = float(D) ** -0.25
    diag_scale = 0.5 * data_normalizer * data_normalizer
    ratio = float(m_real) ** -0.5
    eps = 1e-4

    # data_normalizer folded into the (small) projection; bf16 MXU operand.
    proj_b = (proj_ref[...] * data_normalizer).astype(jnp.bfloat16)        # (M_pad, D)

    # ---- per-head setup (first q-block only): k', sum_n k', k'^T v --------
    @pl.when(pl.program_id(1) == 0)
    def _():
        k2d = k_ref[0]                                                      # (N, D) f32
        k_dash = lax.dot_general(k2d.astype(jnp.bfloat16), proj_b,
                                 (((1,), (1,)), ((), ())),
                                 preferred_element_type=jnp.float32)       # (N, M_pad)
        k_diag = jnp.sum(k2d * k2d, axis=-1, keepdims=True) * diag_scale
        col = lax.broadcasted_iota(jnp.int32, (N, M_pad), 1)
        valid = col < m_real
        k_dash = jnp.where(valid, k_dash, NEG_BIG)
        k_stab = stab_ref[0]                                                # global max (SMEM)
        # Padded feature columns forced to exactly 0 (no eps leakage).
        k_prime = jnp.where(valid,
                            ratio * (jnp.exp(k_dash - k_diag - k_stab) + eps),
                            0.0)                                            # (N, M_pad) f32
        kp_b = k_prime.astype(jnp.bfloat16)
        if compute_weights:
            kp_ref[...] = kp_b                                              # resident k'
        kcs_ref[...] = jnp.sum(k_prime, axis=0, keepdims=True)              # (1, M_pad) f32
        ctx_ref[...] = lax.dot_general(                                      # (M_pad, E)
            kp_b, v_ref[0].astype(jnp.bfloat16), (((0,), (0,)), ((), ())),
            preferred_element_type=jnp.float32).astype(ctx_ref.dtype)

    # ---- per query-block ---------------------------------------------------
    q2d = q_ref[0]                                                           # (TQ, D) f32
    q_dash = lax.dot_general(q2d.astype(jnp.bfloat16), proj_b,
                             (((1,), (1,)), ((), ())),
                             preferred_element_type=jnp.float32)             # (TQ, M_pad)
    q_diag = jnp.sum(q2d * q2d, axis=-1, keepdims=True) * diag_scale
    colq = lax.broadcasted_iota(jnp.int32, (TQ, M_pad), 1)
    validq = colq < m_real
    q_dash = jnp.where(validq, q_dash, NEG_BIG)
    q_stab = jnp.max(q_dash, axis=-1, keepdims=True)                         # is_query: row max
    q_prime = jnp.where(validq,
                        ratio * (jnp.exp(q_dash - q_diag - q_stab) + eps),
                        0.0)                                                 # (TQ, M_pad) f32
    qp_b = q_prime.astype(jnp.bfloat16)

    if compute_weights:
        w = lax.dot_general(qp_b, kp_ref[...], (((1,), (1,)), ((), ())),
                            preferred_element_type=jnp.float32)              # (TQ, N)
        w_ref[0] = w.astype(w_ref.dtype)

    # Linear attention: out = D^-1 q' (k'^T v);  d_inv applied AFTER the matmul.
    denom = jnp.sum(q_prime * kcs_ref[...], axis=-1, keepdims=True)          # (TQ, 1)
    d_inv = pl.reciprocal(denom, approx=True)                                # EUP slot
    out = lax.dot_general(qp_b, ctx_ref[...], (((1,), (0,)), ((), ())),
                          preferred_element_type=jnp.float32)                # (TQ, E) f32
    align_ref[0] = (out * d_inv).astype(align_ref.dtype)


# ----------------------------------------------------------------------------
# Wrapper.
# ----------------------------------------------------------------------------
def _vmem_limit_bytes():
    try:
        kind = jax.devices()[0].device_kind.lower()
    except Exception:
        kind = ""
    if "v7" in kind or "7x" in kind:
        return 40 * 1024 * 1024      # v7x: 64 MiB physical VMEM -> keep headroom
    return 64 * 1024 * 1024          # v5e / v6e: 128 MiB physical VMEM


def _choose_tq(N, weights_bytes_per_elt, vmem_budget):
    """Largest query tile (dividing N, multiple of 8) fitting the VMEM budget."""
    if N <= 128:
        return N
    for tq in (1024, 512, 256, 128):
        if N % tq == 0:
            weights_tile = 2 * tq * N * weights_bytes_per_elt   # double-buffered out
            interm = 8 * tq * LANE * 4                          # dash / q' / etc. (f32)
            if weights_tile + interm + (8 << 20) <= vmem_budget:
                return tq
    return 8 if N % 8 == 0 else N


def fast_attention(q, k, v, projection_matrix, *, compute_weights=True,
                   weights_dtype=jnp.float32):
    H, N, D = q.shape
    E = v.shape[-1]
    M = projection_matrix.shape[0]
    M_pad = pl.cdiv(M, LANE) * LANE

    proj = projection_matrix.astype(jnp.float32)
    proj_padded = jnp.pad(proj, ((0, M_pad - M), (0, 0)))   # zero rows, masked in-kernel

    vmem_limit = _vmem_limit_bytes()
    wbytes = np.dtype(weights_dtype).itemsize if compute_weights else 0
    TQ = _choose_tq(N, wbytes, vmem_limit)
    assert N % TQ == 0, (N, TQ)

    # ---- pass 1: global key stabilizer (max over ALL heads) ---------------
    stab_per_head = pl.pallas_call(
        functools.partial(_k_stabilizer_kernel, m_real=M),
        grid=(H,),
        in_specs=[
            pl.BlockSpec((1, N, D), lambda h: (h, 0, 0)),       # k (per head)
            pl.BlockSpec((M_pad, D), lambda h: (0, 0)),         # projection
        ],
        out_specs=pl.BlockSpec((1, 8, LANE), lambda h: (h, 0, 0)),
        out_shape=jax.ShapeDtypeStruct((H, 8, LANE), jnp.float32),
        compiler_params=pltpu.CompilerParams(
            dimension_semantics=("parallel",),
            vmem_limit_bytes=vmem_limit,
        ),
        cost_estimate=pl.CostEstimate(
            flops=2 * H * N * D * M_pad,
            transcendentals=0,
            bytes_accessed=4 * (k.size + proj_padded.size + H * 8 * LANE),
        ),
    )(k, proj_padded)
    k_stab = jnp.max(stab_per_head).reshape(1)   # (1,) f32 scalar -> SMEM below

    # ---- pass 2: attention --------------------------------------------------
    kernel = functools.partial(_fast_attention_kernel, m_real=M,
                               compute_weights=compute_weights)

    out_shape = [jax.ShapeDtypeStruct((H, N, E), q.dtype)]
    out_specs = [pl.BlockSpec((1, TQ, E), lambda h, qi: (h, qi, 0))]
    if compute_weights:
        out_shape.append(jax.ShapeDtypeStruct((H, N, N), weights_dtype))
        out_specs.append(pl.BlockSpec((1, TQ, N), lambda h, qi: (h, qi, 0)))

    scratch_shapes = []
    if compute_weights:
        scratch_shapes.append(pltpu.VMEM((N, M_pad), jnp.bfloat16))   # resident k'
    scratch_shapes += [
        pltpu.VMEM((M_pad, E), jnp.bfloat16),                          # context = k'^T v
        pltpu.VMEM((1, M_pad), jnp.float32),                           # sum_n k'
    ]

    flops = (2 * H * N * D * M_pad            # k projection (once per head)
             + 2 * H * N * D * M_pad          # q projection
             + 2 * H * N * M_pad * E          # context
             + 2 * H * N * M_pad * E)         # out
    if compute_weights:
        flops += 2 * H * N * N * M_pad
    transcendentals = 2 * H * N * M_pad + H * N
    bytes_accessed = (4 * (q.size + k.size + v.size + proj_padded.size + 1 + H * N * E)
                      + wbytes * (H * N * N if compute_weights else 0))

    results = pl.pallas_call(
        kernel,
        grid=(H, N // TQ),
        in_specs=[
            pl.BlockSpec(memory_space=pltpu.MemorySpace.SMEM),      # global stabilizer (1,)
            pl.BlockSpec((1, TQ, D), lambda h, qi: (h, qi, 0)),     # q (per q-block)
            pl.BlockSpec((1, N, D), lambda h, qi: (h, 0, 0)),       # k (per head, resident)
            pl.BlockSpec((1, N, E), lambda h, qi: (h, 0, 0)),       # v (per head, resident)
            pl.BlockSpec((M_pad, D), lambda h, qi: (0, 0)),         # padded projection
        ],
        out_specs=tuple(out_specs),
        out_shape=tuple(out_shape),
        scratch_shapes=tuple(scratch_shapes),
        compiler_params=pltpu.CompilerParams(
            # qi must be "arbitrary": k'/context/k_cumsum scratch is written at
            # qi == 0 and carried across the q-block sweep; heads are sharded
            # across TensorCores instead.
            dimension_semantics=("parallel", "arbitrary"),
            vmem_limit_bytes=vmem_limit,
        ),
        cost_estimate=pl.CostEstimate(
            flops=flops,
            transcendentals=transcendentals,
            bytes_accessed=bytes_accessed,
        ),
    )(k_stab, q, k, v, proj_padded)

    if compute_weights:
        align, weights = results
        # mask=None path in torch keeps the leading singleton dim on `weights`.
        return align, weights[None]
    align = results[0] if isinstance(results, (tuple, list)) else results
    return align, None


# ----------------------------------------------------------------------------
# Pure-JAX reference (mirrors the PyTorch Performer math, full f32).
# ----------------------------------------------------------------------------
def reference(q, k, v, proj):
    D = q.shape[-1]
    M = proj.shape[0]
    dn = float(D) ** -0.25
    ratio = float(M) ** -0.5
    eps = 1e-4

    def sm_kernel(x, is_query):
        dash = jnp.einsum("hnd,md->hnm", dn * x, proj)
        diag = jnp.sum(x * x, axis=-1, keepdims=True) * 0.5 * dn * dn
        if is_query:
            mx = jnp.max(dash, axis=-1, keepdims=True)
        else:
            mx = jnp.max(dash)
        return ratio * (jnp.exp(dash - diag - mx) + eps)

    qp = sm_kernel(q, True)
    kp = sm_kernel(k, False)
    w = jnp.einsum("hnm,hkm->hnk", qp, kp)[None]
    k_cumsum = jnp.sum(kp, axis=-2)
    d_inv = 1.0 / jnp.einsum("hnm,hm->hn", qp, k_cumsum)
    context = jnp.einsum("hnm,hne->hme", kp, v)
    out = jnp.einsum("hme,hnm,hn->hne", context, qp, d_inv)
    return out, w


if __name__ == "__main__":
    # Small shapes consistent with the module: dim_heads=32, heads=2, seq=8.
    H, N, dim_heads = 2, 8, 32
    nb_features = int(dim_heads * math.log(dim_heads))  # 110, as in __init__

    key = jax.random.PRNGKey(0)
    k_proj, k_q, k_k, k_v = jax.random.split(key, 4)

    projection_matrix = gaussian_orthogonal_random_matrix(
        k_proj, nb_features, dim_heads, scaling=0
    )
    q = jax.random.normal(k_q, (H, N, dim_heads), jnp.float32)
    k = jax.random.normal(k_k, (H, N, dim_heads), jnp.float32)
    v = jax.random.normal(k_v, (H, N, dim_heads), jnp.float32)

    align, weights = jax.block_until_ready(
        jax.jit(functools.partial(fast_attention, compute_weights=True))(
            q, k, v, projection_matrix
        )
    )

    align_ref, weights_ref = reference(q, k, v, projection_matrix)
    # bf16 MXU operands (incl. the projection and the bf16 global stabilizer)
    # + approx reciprocal vs. full-f32 torch math -> modest tolerances.
    np.testing.assert_allclose(np.asarray(align), np.asarray(align_ref),
                               rtol=6e-2, atol=1e-2)
    np.testing.assert_allclose(np.asarray(weights), np.asarray(weights_ref),
                               rtol=6e-2, atol=1e-4)

    assert align.shape == (H, N, dim_heads)
    assert weights.shape == (1, H, N, N)

    # Weights-free (pure O(N)) path — skips the quadratic N x N output entirely.
    align_only, no_w = jax.block_until_ready(
        jax.jit(functools.partial(fast_attention, compute_weights=False))(
            q, k, v, projection_matrix
        )
    )
    assert no_w is None
    np.testing.assert_allclose(np.asarray(align_only), np.asarray(align_ref),
                               rtol=6e-2, atol=1e-2)

    print("KERNEL_OK")
</pallas_src>

<mosaic_0001>
module attributes {stable_mosaic.version = 11 : i64} {
  func.func @_k_stabilizer_kernel(%arg0: i32, %arg1: memref<1x8x32xf32, #tpu.memory_space<vmem>>, %arg2: memref<128x32xf32, #tpu.memory_space<vmem>>, %arg3: memref<1x8x128xf32, #tpu.memory_space<vmem>>) attributes {dimension_semantics = [#tpu.dimension_semantics<parallel>], iteration_bounds = array<i64: 2>, scalar_prefetch = 0 : i64, scratch_operands = 0 : i64, tpu.core_type = #tpu.core_type<tc>, window_params = [{transform_indices = @transform_0, window_bounds = array<i64: 1, 8, 32>}, {pipeline_mode = #tpu.pipeline_mode<synchronous>, transform_indices = @transform_1, window_bounds = array<i64: 128, 32>}, {transform_indices = @transform_2, window_bounds = array<i64: 1, 8, 128>}]} {
    %c0 = arith.constant 0 : index
    %c0_0 = arith.constant 0 : index
    %0 = vector.load %arg2[%c0, %c0_0] : memref<128x32xf32, #tpu.memory_space<vmem>>, vector<128x32xf32>
    %cst = arith.constant 0.420448214 : f32
    %1 = vector.broadcast %cst : f32 to vector<128x32xf32>
    %2 = arith.mulf %0, %1 : vector<128x32xf32>
    %3 = arith.truncf %2 : vector<128x32xf32> to vector<128x32xbf16>
    %c0_1 = arith.constant 0 : index
    %c0_2 = arith.constant 0 : index
    %c0_3 = arith.constant 0 : index
    %4 = vector.load %arg1[%c0_1, %c0_2, %c0_3] : memref<1x8x32xf32, #tpu.memory_space<vmem>>, vector<1x8x32xf32>
    %5 = vector.shape_cast %4 : vector<1x8x32xf32> to vector<8x32xf32>
    %6 = arith.truncf %5 : vector<8x32xf32> to vector<8x32xbf16>
    %cst_4 = arith.constant dense<0.000000e+00> : vector<8x128xf32>
    %7 = tpu.matmul %6, %3, %cst_4 {dimension_numbers = #tpu.dot_dimension_numbers<[1], [1], [0], [0], [0, 0, 1, 0], [], []>} : vector<8x32xbf16>, vector<128x32xbf16>, vector<8x128xf32> -> vector<8x128xf32>
    %8 = tpu.iota {dimensions = array<i32: 1>} : vector<8x128xi32>
    %c110_i32 = arith.constant 110 : i32
    %9 = vector.broadcast %c110_i32 : i32 to vector<8x128xi32>
    %10 = arith.cmpi slt, %8, %9 : vector<8x128xi32>
    %cst_5 = arith.constant -1.000000e+30 : f32
    %11 = vector.broadcast %cst_5 : f32 to vector<8x128xf32>
    %12 = arith.select %10, %7, %11 : vector<8x128xi1>, vector<8x128xf32>
    %13 = vector.shape_cast %12 : vector<8x128xf32> to vector<1x8x128xf32>
    %cst_6 = arith.constant dense<0xFF800000> : vector<1xf32>
    %14 = vector.multi_reduction <maximumf>, %13, %cst_6 [1, 2] : vector<1x8x128xf32> to vector<1xf32>
    %15 = vector.shape_cast %14 : vector<1xf32> to vector<1x1x1xf32>
    %16 = vector.extract %15[0, 0, 0] : f32 from vector<1x1x1xf32>
    %17 = vector.broadcast %16 : f32 to vector<8x128xf32>
    %c0_7 = arith.constant 0 : index
    %c0_8 = arith.constant 0 : index
    %c0_9 = arith.constant 0 : index
    %18 = vector.load %arg3[%c0_7, %c0_8, %c0_9] : memref<1x8x128xf32, #tpu.memory_space<vmem>>, vector<1x8x128xf32>
    %19 = vector.shape_cast %18 : vector<1x8x128xf32> to vector<8x128xf32>
    %20 = vector.shape_cast %17 : vector<8x128xf32> to vector<1x8x128xf32>
    tpu.vector_store %arg3[%c0_7, %c0_8, %c0_9], %20 {strides = array<i32>} : memref<1x8x128xf32, #tpu.memory_space<vmem>>, vector<1x8x128xf32>,
    return
  }
  func.func @transform_0(%arg0: i32) -> (i32, i32, i32) {
    %c0_i32 = arith.constant 0 : i32
    %c0_i32_0 = arith.constant 0 : i32
    %c0_i32_1 = arith.constant 0 : i32
    return %arg0, %c0_i32, %c0_i32_0 : i32, i32, i32
  }
  func.func @transform_1(%arg0: i32) -> (i32, i32) {
    %c0_i32 = arith.constant 0 : i32
    %c0_i32_0 = arith.constant 0 : i32
    %c0_i32_1 = arith.constant 0 : i32
    return %c0_i32, %c0_i32_0 : i32, i32
  }
  func.func @transform_2(%arg0: i32) -> (i32, i32, i32) {
    %c0_i32 = arith.constant 0 : i32
    %c0_i32_0 = arith.constant 0 : i32
    %c0_i32_1 = arith.constant 0 : i32
    return %arg0, %c0_i32, %c0_i32_0 : i32, i32, i32
  }
}

module attributes {stable_mosaic.version = 11 : i64} {
  func.func @_fast_attention_kernel(%arg0: i32, %arg1: i32, %arg2: memref<1xf32, #tpu.memory_space<smem>>, %arg3: memref<1x8x32xf32, #tpu.memory_space<vmem>>, %arg4: memref<1x8x32xf32, #tpu.memory_space<vmem>>, %arg5: memref<1x8x32xf32, #tpu.memory_space<vmem>>, %arg6: memref<128x32xf32, #tpu.memory_space<vmem>>, %arg7: memref<1x8x32xf32, #tpu.memory_space<vmem>>, %arg8: memref<1x8x8xf32, #tpu.memory_space<vmem>>, %arg9: memref<8x128xbf16, #tpu.memory_space<vmem>>, %arg10: memref<128x32xbf16, #tpu.memory_space<vmem>>, %arg11: memref<1x128xf32, #tpu.memory_space<vmem>>) attributes {dimension_semantics = [#tpu.dimension_semantics<parallel>, #tpu.dimension_semantics<arbitrary>], iteration_bounds = array<i64: 2, 1>, scalar_prefetch = 0 : i64, scratch_operands = 3 : i64, tpu.core_type = #tpu.core_type<tc>, window_params = [{transform_indices = @transform_0, window_bounds = array<i64: 1>}, {transform_indices = @transform_1, window_bounds = array<i64: 1, 8, 32>}, {transform_indices = @transform_2, window_bounds = array<i64: 1, 8, 32>}, {transform_indices = @transform_3, window_bounds = array<i64: 1, 8, 32>}, {pipeline_mode = #tpu.pipeline_mode<synchronous>, transform_indices = @transform_4, window_bounds = array<i64: 128, 32>}, {transform_indices = @transform_5, window_bounds = array<i64: 1, 8, 32>}, {transform_indices = @transform_6, window_bounds = array<i64: 1, 8, 8>}]} {
    %c0 = arith.constant 0 : index
    %c0_0 = arith.constant 0 : index
    %0 = vector.load %arg6[%c0, %c0_0] : memref<128x32xf32, #tpu.memory_space<vmem>>, vector<128x32xf32>
    %cst = arith.constant 0.420448214 : f32
    %1 = vector.broadcast %cst : f32 to vector<128x32xf32>
    %2 = arith.mulf %0, %1 : vector<128x32xf32>
    %3 = arith.truncf %2 : vector<128x32xf32> to vector<128x32xbf16>
    %c0_i32 = arith.constant 0 : i32
    %4 = arith.cmpi eq, %arg1, %c0_i32 : i32
    %5 = arith.extui %4 : i1 to i32
    %c0_i32_1 = arith.constant 0 : i32
    %6 = arith.cmpi ne, %5, %c0_i32_1 : i32
    scf.if %6 {
      %c0_28 = arith.constant 0 : index
      %c0_29 = arith.constant 0 : index
      %c0_30 = arith.constant 0 : index
      %53 = vector.load %arg4[%c0_28, %c0_29, %c0_30] : memref<1x8x32xf32, #tpu.memory_space<vmem>>, vector<1x8x32xf32>
      %54 = vector.shape_cast %53 : vector<1x8x32xf32> to vector<8x32xf32>
      %55 = arith.truncf %54 : vector<8x32xf32> to vector<8x32xbf16>
      %cst_31 = arith.constant dense<0.000000e+00> : vector<8x128xf32>
      %56 = tpu.matmul %55, %3, %cst_31 {dimension_numbers = #tpu.dot_dimension_numbers<[1], [1], [0], [0], [0, 0, 1, 0], [], []>} : vector<8x32xbf16>, vector<128x32xbf16>, vector<8x128xf32> -> vector<8x128xf32>
      %57 = arith.mulf %54, %54 : vector<8x32xf32>
      %cst_32 = arith.constant dense<0.000000e+00> : vector<8xf32>
      %58 = vector.multi_reduction <add>, %57, %cst_32 [1] : vector<8x32xf32> to vector<8xf32>
      %59 = vector.shape_cast %58 : vector<8xf32> to vector<8x1xf32>
      %cst_33 = arith.constant 0.0883883461 : f32
      %60 = vector.broadcast %cst_33 : f32 to vector<8x1xf32>
      %61 = arith.mulf %59, %60 : vector<8x1xf32>
      %62 = tpu.iota {dimensions = array<i32: 1>} : vector<8x128xi32>
      %c110_i32_34 = arith.constant 110 : i32
      %63 = vector.broadcast %c110_i32_34 : i32 to vector<8x128xi32>
      %64 = arith.cmpi slt, %62, %63 : vector<8x128xi32>
      %cst_35 = arith.constant -1.000000e+30 : f32
      %65 = vector.broadcast %cst_35 : f32 to vector<8x128xf32>
      %66 = arith.select %64, %56, %65 : vector<8x128xi1>, vector<8x128xf32>
      %c0_36 = arith.constant 0 : index
      %67 = memref.load %arg2[%c0_36] : memref<1xf32, #tpu.memory_space<smem>>
      %68 = vector.broadcast %61 : vector<8x1xf32> to vector<8x128xf32>
      %69 = arith.subf %66, %68 : vector<8x128xf32>
      %70 = vector.broadcast %67 : f32 to vector<8x128xf32>
      %71 = arith.subf %69, %70 : vector<8x128xf32>
      %72 = math.exp %71 : vector<8x128xf32>
      %cst_37 = arith.constant 9.99999974E-5 : f32
      %73 = vector.broadcast %cst_37 : f32 to vector<8x128xf32>
      %74 = arith.addf %72, %73 : vector<8x128xf32>
      %cst_38 = arith.constant 0.0953462571 : f32
      %75 = vector.broadcast %cst_38 : f32 to vector<8x128xf32>
      %76 = arith.mulf %75, %74 : vector<8x128xf32>
      %cst_39 = arith.constant 0.000000e+00 : f32
      %77 = vector.broadcast %cst_39 : f32 to vector<8x128xf32>
      %78 = arith.select %64, %76, %77 : vector<8x128xi1>, vector<8x128xf32>
      %79 = arith.truncf %78 : vector<8x128xf32> to vector<8x128xbf16>
      %c0_40 = arith.constant 0 : index
      %c0_41 = arith.constant 0 : index
      %80 = vector.load %arg9[%c0_40, %c0_41] : memref<8x128xbf16, #tpu.memory_space<vmem>>, vector<8x128xbf16>
      tpu.vector_store %arg9[%c0_40, %c0_41], %79 {strides = array<i32>} : memref<8x128xbf16, #tpu.memory_space<vmem>>, vector<8x128xbf16>,
      %cst_42 = arith.constant dense<0.000000e+00> : vector<128xf32>
      %81 = vector.multi_reduction <add>, %78, %cst_42 [0] : vector<8x128xf32> to vector<128xf32>
      %82 = vector.shape_cast %81 : vector<128xf32> to vector<1x128xf32>
      %c0_43 = arith.constant 0 : index
      %c0_44 = arith.constant 0 : index
      %83 = vector.load %arg11[%c0_43, %c0_44] : memref<1x128xf32, #tpu.memory_space<vmem>>, vector<1x128xf32>
      tpu.vector_store %arg11[%c0_43, %c0_44], %82 {strides = array<i32>} : memref<1x128xf32, #tpu.memory_space<vmem>>, vector<1x128xf32>,
      %c0_45 = arith.constant 0 : index
      %c0_46 = arith.constant 0 : index
      %c0_47 = arith.constant 0 : index
      %84 = vector.load %arg5[%c0_45, %c0_46, %c0_47] : memref<1x8x32xf32, #tpu.memory_space<vmem>>, vector<1x8x32xf32>
      %85 = vector.shape_cast %84 : vector<1x8x32xf32> to vector<8x32xf32>
      %86 = arith.truncf %85 : vector<8x32xf32> to vector<8x32xbf16>
      %cst_48 = arith.constant dense<0.000000e+00> : vector<128x32xf32>
      %87 = tpu.matmul %79, %86, %cst_48 {dimension_numbers = #tpu.dot_dimension_numbers<[0], [0], [1], [1], [0, 1, 1, 1], [], []>} : vector<8x128xbf16>, vector<8x32xbf16>, vector<128x32xf32> -> vector<128x32xf32>
      %88 = arith.truncf %87 : vector<128x32xf32> to vector<128x32xbf16>
      %c0_49 = arith.constant 0 : index
      %c0_50 = arith.constant 0 : index
      %89 = vector.load %arg10[%c0_49, %c0_50] : memref<128x32xbf16, #tpu.memory_space<vmem>>, vector<128x32xbf16>
      tpu.vector_store %arg10[%c0_49, %c0_50], %88 {strides = array<i32>} : memref<128x32xbf16, #tpu.memory_space<vmem>>, vector<128x32xbf16>,
    } else {
    }
    %c0_2 = arith.constant 0 : index
    %c0_3 = arith.constant 0 : index
    %c0_4 = arith.constant 0 : index
    %7 = vector.load %arg3[%c0_2, %c0_3, %c0_4] : memref<1x8x32xf32, #tpu.memory_space<vmem>>, vector<1x8x32xf32>
    %8 = vector.shape_cast %7 : vector<1x8x32xf32> to vector<8x32xf32>
    %9 = arith.truncf %8 : vector<8x32xf32> to vector<8x32xbf16>
    %cst_5 = arith.constant dense<0.000000e+00> : vector<8x128xf32>
    %10 = tpu.matmul %9, %3, %cst_5 {dimension_numbers = #tpu.dot_dimension_numbers<[1], [1], [0], [0], [0, 0, 1, 0], [], []>} : vector<8x32xbf16>, vector<128x32xbf16>, vector<8x128xf32> -> vector<8x128xf32>
    %11 = arith.mulf %8, %8 : vector<8x32xf32>
    %cst_6 = arith.constant dense<0.000000e+00> : vector<8xf32>
    %12 = vector.multi_reduction <add>, %11, %cst_6 [1] : vector<8x32xf32> to vector<8xf32>
    %13 = vector.shape_cast %12 : vector<8xf32> to vector<8x1xf32>
    %cst_7 = arith.constant 0.0883883461 : f32
    %14 = vector.broadcast %cst_7 : f32 to vector<8x1xf32>
    %15 = arith.mulf %13, %14 : vector<8x1xf32>
    %16 = tpu.iota {dimensions = array<i32: 1>} : vector<8x128xi32>
    %c110_i32 = arith.constant 110 : i32
    %17 = vector.broadcast %c110_i32 : i32 to vector<8x128xi32>
    %18 = arith.cmpi slt, %16, %17 : vector<8x128xi32>
    %cst_8 = arith.constant -1.000000e+30 : f32
    %19 = vector.broadcast %cst_8 : f32 to vector<8x128xf32>
    %20 = arith.select %18, %10, %19 : vector<8x128xi1>, vector<8x128xf32>
    %cst_9 = arith.constant dense<0xFF800000> : vector<8xf32>
    %21 = vector.multi_reduction <maximumf>, %20, %cst_9 [1] : vector<8x128xf32> to vector<8xf32>
    %22 = vector.shape_cast %21 : vector<8xf32> to vector<8x1xf32>
    %23 = vector.broadcast %15 : vector<8x1xf32> to vector<8x128xf32>
    %24 = arith.subf %20, %23 : vector<8x128xf32>
    %25 = vector.broadcast %22 : vector<8x1xf32> to vector<8x128xf32>
    %26 = arith.subf %24, %25 : vector<8x128xf32>
    %27 = math.exp %26 : vector<8x128xf32>
    %cst_10 = arith.constant 9.99999974E-5 : f32
    %28 = vector.broadcast %cst_10 : f32 to vector<8x128xf32>
    %29 = arith.addf %27, %28 : vector<8x128xf32>
    %cst_11 = arith.constant 0.0953462571 : f32
    %30 = vector.broadcast %cst_11 : f32 to vector<8x128xf32>
    %31 = arith.mulf %30, %29 : vector<8x128xf32>
    %cst_12 = arith.constant 0.000000e+00 : f32
    %32 = vector.broadcast %cst_12 : f32 to vector<8x128xf32>
    %33 = arith.select %18, %31, %32 : vector<8x128xi1>, vector<8x128xf32>
    %34 = arith.truncf %33 : vector<8x128xf32> to vector<8x128xbf16>
    %c0_13 = arith.constant 0 : index
    %c0_14 = arith.constant 0 : index
    %35 = vector.load %arg9[%c0_13, %c0_14] : memref<8x128xbf16, #tpu.memory_space<vmem>>, vector<8x128xbf16>
    %cst_15 = arith.constant dense<0.000000e+00> : vector<8x8xf32>
    %36 = tpu.matmul %34, %35, %cst_15 {dimension_numbers = #tpu.dot_dimension_numbers<[1], [1], [0], [0], [0, 0, 1, 0], [], []>} : vector<8x128xbf16>, vector<8x128xbf16>, vector<8x8xf32> -> vector<8x8xf32>
    %c0_16 = arith.constant 0 : index
    %c0_17 = arith.constant 0 : index
    %c0_18 = arith.constant 0 : index
    %37 = vector.load %arg8[%c0_16, %c0_17, %c0_18] : memref<1x8x8xf32, #tpu.memory_space<vmem>>, vector<1x8x8xf32>
    %38 = vector.shape_cast %37 : vector<1x8x8xf32> to vector<8x8xf32>
    %39 = vector.shape_cast %36 : vector<8x8xf32> to vector<1x8x8xf32>
    tpu.vector_store %arg8[%c0_16, %c0_17, %c0_18], %39 {strides = array<i32>} : memref<1x8x8xf32, #tpu.memory_space<vmem>>, vector<1x8x8xf32>,
    %c0_19 = arith.constant 0 : index
    %c0_20 = arith.constant 0 : index
    %40 = vector.load %arg11[%c0_19, %c0_20] : memref<1x128xf32, #tpu.memory_space<vmem>>, vector<1x128xf32>
    %41 = vector.broadcast %40 : vector<1x128xf32> to vector<8x128xf32>
    %42 = arith.mulf %33, %41 : vector<8x128xf32>
    %cst_21 = arith.constant dense<0.000000e+00> : vector<8xf32>
    %43 = vector.multi_reduction <add>, %42, %cst_21 [1] : vector<8x128xf32> to vector<8xf32>
    %44 = vector.shape_cast %43 : vector<8xf32> to vector<8x1xf32>
    %45 = tpu.reciprocal %44 {approx = true} : vector<8x1xf32> -> vector<8x1xf32>
    %c0_22 = arith.constant 0 : index
    %c0_23 = arith.constant 0 : index
    %46 = vector.load %arg10[%c0_22, %c0_23] : memref<128x32xbf16, #tpu.memory_space<vmem>>, vector<128x32xbf16>
    %cst_24 = arith.constant dense<0.000000e+00> : vector<8x32xf32>
    %47 = tpu.matmul %34, %46, %cst_24 {dimension_numbers = #tpu.dot_dimension_numbers<[1], [0], [0], [1], [0, 0, 1, 1], [], []>} : vector<8x128xbf16>, vector<128x32xbf16>, vector<8x32xf32> -> vector<8x32xf32>
    %48 = vector.broadcast %45 : vector<8x1xf32> to vector<8x32xf32>
    %49 = arith.mulf %47, %48 : vector<8x32xf32>
    %c0_25 = arith.constant 0 : index
    %c0_26 = arith.constant 0 : index
    %c0_27 = arith.constant 0 : index
    %50 = vector.load %arg7[%c0_25, %c0_26, %c0_27] : memref<1x8x32xf32, #tpu.memory_space<vmem>>, vector<1x8x32xf32>
    %51 = vector.shape_cast %50 : vector<1x8x32xf32> to vector<8x32xf32>
    %52 = vector.shape_cast %49 : vector<8x32xf32> to vector<1x8x32xf32>
    tpu.vector_store %arg7[%c0_25, %c0_26, %c0_27], %52 {strides = array<i32>} : memref<1x8x32xf32, #tpu.memory_space<vmem>>, vector<1x8x32xf32>,
    return
  }
  func.func @transform_0(%arg0: i32, %arg1: i32) -> i32 {
    %c0_i32 = arith.constant 0 : i32
    %c0_i32_0 = arith.constant 0 : i32
    return %c0_i32 : i32
  }
  func.func @transform_1(%arg0: i32, %arg1: i32) -> (i32, i32, i32) {
    %c0_i32 = arith.constant 0 : i32
    %c0_i32_0 = arith.constant 0 : i32
    return %arg0, %arg1, %c0_i32 : i32, i32, i32
  }
  func.func @transform_2(%arg0: i32, %arg1: i32) -> (i32, i32, i32) {
    %c0_i32 = arith.constant 0 : i32
    %c0_i32_0 = arith.constant 0 : i32
    %c0_i32_1 = arith.constant 0 : i32
    return %arg0, %c0_i32, %c0_i32_0 : i32, i32, i32
  }
  func.func @transform_3(%arg0: i32, %arg1: i32) -> (i32, i32, i32) {
    %c0_i32 = arith.constant 0 : i32
    %c0_i32_0 = arith.constant 0 : i32
    %c0_i32_1 = arith.constant 0 : i32
    return %arg0, %c0_i32, %c0_i32_0 : i32, i32, i32
  }
  func.func @transform_4(%arg0: i32, %arg1: i32) -> (i32, i32) {
    %c0_i32 = arith.constant 0 : i32
    %c0_i32_0 = arith.constant 0 : i32
    %c0_i32_1 = arith.constant 0 : i32
    return %c0_i32, %c0_i32_0 : i32, i32
  }
  func.func @transform_5(%arg0: i32, %arg1: i32) -> (i32, i32, i32) {
    %c0_i32 = arith.constant 0 : i32
    %c0_i32_0 = arith.constant 0 : i32
    return %arg0, %arg1, %c0_i32 : i32, i32, i32
  }
  func.func @transform_6(%arg0: i32, %arg1: i32) -> (i32, i32, i32) {
    %c0_i32 = arith.constant 0 : i32
    %c0_i32_0 = arith.constant 0 : i32
    return %arg0, %arg1, %c0_i32 : i32, i32, i32
  }
}

</mosaic_0001>

<bundles_post_ra>
// kernel: fast_attention.2
= control target key start
LH: loop header
LB: loop body
LE: loop exit
PB: predicated region body
PF: predicated region fallthrough
CT: control target
= control target key end

     0   :  { %7 = vsyncpa [#allocation3], 0  ;;  %s874_s0 = inlined_call_operand.hbm [shape: f32[2,8,32], index: 0, kind: input, shape index: {}]   ;;  %s875_s1 = inlined_call_operand.hbm [shape: f32[128,32], index: 1, kind: input, shape index: {}]   ;;  %s876_s2 = inlined_call_operand.hbm [shape: f32[2,8,128], index: 2, kind: output, shape index: {}]  }
   0x1   :  { %9 = vsyncpa [#allocation3 + $0x1], 0 }
   0x2   :  { %10 = vsyncpa [#allocation6], 0 }
   0x3   :  { %11 = vsyncpa [#allocation4], 0 }
   0x4   :  { %13 = vsyncpa [#allocation4 + $0x1], 0  ;;  %s653_s9 = smov 0   ;;  %s655_s10 = smov 0  }
   0x5   :  { %s657_s11 = smov 0   ;;  %s659_s12 = smov 0  }
   0x6 LB: > { %s674_s13 = sadd.s32 4294967295, %s629_s12   ;;  %s394_s14 = sadd.s32 4294967294, %s629_s12   ;;  %s629_s12 = sphi %s659_s12, %s896_s12   ;;  %s625_s11 = sphi %s657_s11, %s895_s11   ;;  %s621_s10 = sphi %s655_s10, %s894_s10   ;;  %s617_s9 = sphi %s653_s9, %s893_s9  }
   0x7   : > { %p39_p0 = scmp.ne.s32.totalorder %s621_s10, %s617_s9  ;;  %p877_p1 = scmp.eq.s32.totalorder %s674_s13, 0 }
   0x8   : > { %p90_p3 = scmp.eq.s32.totalorder %s394_s14, 1  ;;  %p395_p5 = scmp.ge.s32.totalorder %s629_s12, 1 }
   0x9   : > { %p683_p4 = por %p877_p1, %p39_p0  ;;  %p97_p7 = scmp.lt.s32.totalorder %s629_s12, 3 }
   0xa   : > { %p688_p6 = por %p90_p3, %p39_p0  ;;  %s631_s18 = smov [#allocation5]  }
   0xb   : > { %s880_s15 = scalar_select %p683_p4, 1, 0 }
   0xc   : > { %s881_s16 = scalar_select %p688_p6, 1, 0 }
   0xd   : > { %p693_p8 = pnand %p395_p5, %p97_p7  ;;  %s109_s19 = sshll.u32 %s631_s18, 4  ;;  %s697_s19 = int_to_ptr.vmem [resolvable:$true] %s109_s19 }
   0xe   : > { %s709_s21 = sadd.s32 1, %s629_s12   ;;  %s26_s22 = sadd.s32 1, %s625_s11 }
   0xf   : > { %s882_s17 = scalar_select %p693_p8, 1, 0 }
  0x10   : > { %p448_p9 = pneg %p693_p8  ;;  %s23_s23 = ssub.s32 %s629_s12, %s709_s21 }
  0x11   : > { %s501_s26 = scalar_lea.hbm %s875_s1, 2048 }
  0x12   : > { %p704_p11 = pnand %p448_p9, %p877_p1  ;;  %p502_p12 = scmp.ne.s32.totalorder %s875_s1, %s501_s26 }
  0x13   : > { %p508_p5 = scmp.lt.u32.totalorder %s501_s26, %s875_s1 }
  0x14   : > { %p503_p13 = pneg %p704_p11 }
  0x16   : > { %p504_p0 = pnand %p503_p13, %p502_p12 }
  0x18   : > { %p505_p3 = pneg %p504_p0 }
  0x1a   : > { %p510_p7 = pnand %p508_p5, %p505_p3 }
  0x1c   : > { %513 = shalt.err (!%p510_p7)
}
  0x1d   : > { %s514_s3 = scalar_lea.vmem %s697_s19, 2048  ;;  %p522_p2 = scmp.lt.s32.totalorder %s697_s19, %s697_s19 }
  0x1e   : > { %p515_p9 = scmp.ne.s32.totalorder %s697_s19, %s514_s3  ;;  %p523_p6 = scmp.lt.s32.totalorder %s514_s3, %s514_s3 }
  0x20   : > { %p517_p10 = pnand %p515_p9, %p503_p13  ;;  %p524_p4 = por %p523_p6, %p522_p2 }
  0x22   : > { %p518_p1 = pneg %p517_p10 }
  0x24   : > { %p525_p8 = pnand %p524_p4, %p518_p1 }
  0x26   : > { %528 = shalt.err (!%p525_p8)
}
  0x27   : > { %s632_s4 = smov 128   ;;  %s633_s5 = smov 8  }
  0x28   : > { %451 = dma.hbm_to_vmem [thread:$0]  (!%p704_p11), %s875_s1, 2048, %s697_s19, [#allocation6], %s632_s4, %s632_s4, %s633_s5  }
  0x29   : > { %p24_p2 = scmp.eq.s32.totalorder %s23_s23, 0  ;;  %p33_p1 = scmp.ne.s32.totalorder %s625_s11, %s621_s10 }
  0x2a   : > { %p34_p4 = scmp.eq.s32.totalorder %s629_s12, 0  ;;  %p461_p6 = scmp.lt.s32.totalorder %s629_s12, 2 }
  0x2b   : > { %s740_s8 = scalar_select %p24_p2, %s625_s11, %s26_s22  }
  0x2c   : > { %p35_p8 = por %p34_p4, %p33_p1  ;;  %p884_p10 = scmp.eq.s32.totalorder %s674_s13, 1 }
  0x2d   : > { %s123_s18 = sand.u32 1, %s625_s11   ;;  %s399_s24 = sshll.u32 %s629_s12, 7 }
  0x2e   : > { %p744_p12 = por %p884_p10, %p33_p1  ;;  %s398_s25 = sshll.u32 %s123_s18, 3 }
  0x2f   : > { %s753_s27 = scalar_lea.hbm %s874_s0, %s399_s24  ;;  %s127_s19 = scalar_lea.vmem [#allocation2], %s398_s25 }
  0x30   : > { %s134_s22 = sshll.u32 %s127_s19, 4  ;;  %p755_p11 = pnand %p461_p6, %p35_p8  ;;  %s759_s22 = int_to_ptr.vmem [resolvable:$true] %s134_s22 }
  0x31   : > { %s124_s28 = scalar_lea.sflag [#allocation3], %s123_s18  ;;  %s529_s29 = scalar_lea.hbm %s753_s27, 128 }
  0x32   : > { %p530_p13 = scmp.ne.s32.totalorder %s753_s27, %s529_s29  ;;  %p531_p0 = pneg %p755_p11 }
  0x33   : > { %s534_s4 = scalar_lea.hbm %s874_s0, 256  ;;  %p535_p7 = scmp.lt.u32.totalorder %s753_s27, %s874_s0 }
  0x34   : > { %p532_p3 = pnand %p531_p0, %p530_p13  ;;  %p536_p9 = scmp.lt.u32.totalorder %s534_s4, %s529_s29 }
  0x35   : > { %p538_p1 = scmp.lt.u32.totalorder %s529_s29, %s753_s27 }
  0x36   : > { %p533_p5 = pneg %p532_p3  ;;  %p537_p2 = por %p536_p9, %p535_p7 }
  0x38   : > { %p539_p4 = por %p538_p1, %p537_p2 }
  0x3a   : > { %p540_p6 = pnand %p539_p4, %p533_p5 }
  0x3c   : > { %543 = shalt.err (!%p540_p6)
}
  0x3d   : > { %s544_s7 = scalar_lea.vmem %s759_s22, 128  ;;  %s634_s18 = smov [#allocation2]  }
  0x3e   : > { %p545_p8 = scmp.ne.s32.totalorder %s759_s22, %s544_s7  ;;  %s549_s24 = sshll.u32 %s634_s18, 4  ;;  %s550_s24 = int_to_ptr.vmem [resolvable:$false] %s549_s24 }
  0x3f   : > { %s551_s25 = scalar_lea.vmem %s550_s24, 256  ;;  %p552_p3 = scmp.lt.s32.totalorder %s759_s22, %s550_s24 }
  0x40   : > { %p547_p10 = pnand %p545_p8, %p531_p0  ;;  %p553_p7 = scmp.lt.s32.totalorder %s551_s25, %s544_s7 }
  0x42   : > { %p548_p13 = pneg %p547_p10  ;;  %p554_p9 = por %p553_p7, %p552_p3 }
  0x44   : > { %p555_p2 = pnand %p554_p9, %p548_p13 }
  0x46   : > { %558 = shalt.err (!%p555_p2)
}
  0x47   : > { %455 = dma.hbm_to_vmem [thread:$0]  (!%p755_p11), %s753_s27, 128, %s759_s22, %s124_s28  }
  0x48   : > { %p887_p5 = scmp.ne.s32.totalorder %s882_s17, 0 }
  0x49   : > { %s789_s20 = sand.u32 (!%p887_p5), 1, %s621_s10   ;;  %p888_p0 = scmp.ne.s32.totalorder (!%p887_p5), %s880_s15, 0 }
  0x4a   : > { %143 = sbr.rel (%p887_p5) target bundleno = 586 (0x24a), region = 28  ;;  %s401_s26 = sshll.u32 (!%p887_p5), %s789_s20, 3 }
  0x4b   : > { %s146_s19 = scalar_lea.sflag (!%p887_p5), [#allocation3], %s789_s20  ;;  %s795_s29 = scalar_lea.vmem (!%p887_p5), [#allocation2], %s401_s26 }
  0x51   : > { %604 = dma.done.wait (%p888_p0), %s146_s19, 128  }
  0x52   : > { %606 = vsyncadd (%p888_p0), %s146_s19, 4294967168  ;;  %p889_p11 = scmp.eq.s32.totalorder %s674_s13, 0 }
  0x54   : > { %608 = dma.done.wait (%p889_p11), [#allocation6], 2048   ;;  %p890_p1 = pmov %p889_p11 }
  0x55   : > { %v635_v0 = vmov 0.0   ;;  %vm636_vm0 = vmmov 0   ;;  %v175_v1 = vld [vmem:[#allocation5] sm:$0xff]  ;;  %v176_v2 = vld [vmem:[#allocation5 + $0x8] sm:$0xff]  ;;  %v177_v3 = vld [vmem:[#allocation5 + $0x10] sm:$0xff]  ;;  %vm217_vm1 = vcmask 261120   ;;  %v285_v51 = vlaneseq }
  0x56   : > { %610 = vsyncadd (%p890_p1), [#allocation6], 4294965248  ;;  %418 = vmatprep.subr.bf16.mxu0 %v635_v0  ;;  %434 = vmatprep.mubr.msk.bf16.mxu0 %vm636_vm0, %v635_v0  ;;  %v191_v4 = vmul.f32 0.4204482, %v175_v1  ;;  %v192_v5 = vmul.f32 0.4204482, %v176_v2 }
  0x57   : > { %v178_v6 = vld [vmem:[#allocation5 + $0x18] sm:$0xff]  ;;  %v193_v8 = vmul.f32 0.4204482, %v177_v3  ;;  %v179_v12 = vld [vmem:[#allocation5 + $0x20] sm:$0xff]  ;;  %v180_v13 = vld [vmem:[#allocation5 + $0x28] sm:$0xff]  ;;  %v286_v52 = vand.u32 127, %v285_v51 }
  0x58   : > { %v207_v7 = vpack.c.bf16 %v192_v5, %v191_v4  ;;  %v194_v9 = vmul.f32 0.4204482, %v178_v6  ;;  %v195_v15 = vmul.f32 0.4204482, %v179_v12  ;;  %v196_v16 = vmul.f32 0.4204482, %v180_v13 }
  0x59   : > { %v181_v18 = vld [vmem:[#allocation5 + $0x30] sm:$0xff]  ;;  %v182_v19 = vld [vmem:[#allocation5 + $0x38] sm:$0xff]  ;;  %v183_v24 = vld [vmem:[#allocation5 + $0x40] sm:$0xff]  ;;  %vm287_vm2 = vcmp.lt.s32.totalorder %v286_v52, 110  ;;  %s173_s15 = scalar_lea.vmem [#allocation7], %s401_s26  ;;  %s406_s27 = sshll.u32 %s674_s13, 7 }
  0x5a   : > { %v222_v10 = vsel %vm217_vm1, %v207_v7, 0  ;;  %v208_v11 = vpack.c.bf16 %v194_v9, %v193_v8  ;;  %v209_v17 = vpack.c.bf16 %v196_v16, %v195_v15  ;;  %v197_v21 = vmul.f32 0.4204482, %v181_v18  ;;  %v184_v25 = vld [vmem:[#allocation5 + $0x48] sm:$0xff]  ;;  %v185_v30 = vld [vmem:[#allocation5 + $0x50] sm:$0xff]  ;;  %v186_v31 = vld [vmem:[#allocation5 + $0x58] sm:$0xff]  ;;  %s832_s30 = scalar_lea.hbm %s876_s2, %s406_s27 }
  0x5b   : > { %419 = vmatpush3.bf16.xpose.msra.mxu0 %v222_v10  ;;  %v198_v22 = vmul.f32 0.4204482, %v182_v19  ;;  %v199_v27 = vmul.f32 0.4204482, %v183_v24  ;;  %v200_v28 = vmul.f32 0.4204482, %v184_v25 }
  0x5c   : > { %420 = vmatprep.subr.bf16.mxu0 %v635_v0  ;;  %v225_v14 = vsel %vm217_vm1, %v208_v11, 0  ;;  %v228_v20 = vsel %vm217_vm1, %v209_v17, 0  ;;  %v201_v33 = vmul.f32 0.4204482, %v185_v30  ;;  %v202_v34 = vmul.f32 0.4204482, %v186_v31 }
  0x5d   : > { %v210_v23 = vpack.c.bf16 %v198_v22, %v197_v21  ;;  %v211_v29 = vpack.c.bf16 %v200_v28, %v199_v27  ;;  %v187_v36 = vld [vmem:[#allocation5 + $0x60] sm:$0xff]  ;;  %v188_v37 = vld [vmem:[#allocation5 + $0x68] sm:$0xff]  ;;  %v189_v42 = vld [vmem:[#allocation5 + $0x70] sm:$0xff]  ;;  %s314_s17 = sshll.u32 %s173_s15, 4  ;;  %s301_s3 = scalar_lea.sflag [#allocation4], %s789_s20  ;;  %s827_s17 = int_to_ptr.vmem [resolvable:$true] %s314_s17 }
  0x5e   : > { %v212_v35 = vpack.c.bf16 %v202_v34, %v201_v33  ;;  %v203_v39 = vmul.f32 0.4204482, %v187_v36  ;;  %v204_v40 = vmul.f32 0.4204482, %v188_v37  ;;  %v190_v43 = vld [vmem:[#allocation5 + $0x78] sm:$0xff]  ;;  %s559_s4 = scalar_lea.vmem %s827_s17, 128 }
  0x5f   : > { %v231_v26 = vsel %vm217_vm1, %v210_v23, 0  ;;  %v234_v32 = vsel %vm217_vm1, %v211_v29, 0  ;;  %v205_v45 = vmul.f32 0.4204482, %v189_v42  ;;  %v206_v46 = vmul.f32 0.4204482, %v190_v43  ;;  %p560_p4 = scmp.ne.s32.totalorder %s827_s17, %s559_s4 }
  0x60   : > { %v237_v38 = vsel %vm217_vm1, %v212_v35, 0  ;;  %v213_v41 = vpack.c.bf16 %v204_v40, %v203_v39  ;;  %v215_v49 = vld [vmem:[%s795_s29] sm:$0xff]  ;;  %s637_s13 = smov [#allocation7]  }
  0x61   : > { %v214_v47 = vpack.c.bf16 %v206_v46, %v205_v45  ;;  %v216_v50 = vpack.c.bf16 %v215_v49, %v215_v49  ;;  %p561_p6 = pnand %p560_p4, %p744_p12  ;;  %s563_s5 = sshll.u32 %s637_s13, 4  ;;  %s564_s5 = int_to_ptr.vmem [resolvable:$false] %s563_s5 }
  0x62   : > { %v240_v44 = vsel %vm217_vm1, %v213_v41, 0  ;;  %s565_s6 = scalar_lea.vmem %s564_s5, 256  ;;  %p566_p10 = scmp.lt.s32.totalorder %s827_s17, %s564_s5 }
  0x63   : > { %421 = vmatpush3.bf16.xpose.msra.mxu0 %v225_v14  ;;  %v243_v48 = vsel %vm217_vm1, %v214_v47, 0  ;;  %p562_p8 = pneg %p561_p6  ;;  %p567_p13 = scmp.lt.s32.totalorder %s565_s6, %s559_s4 }
  0x64   : > { %422 = vmatprep.subr.bf16.mxu0 %v635_v0 }
  0x65   : > { %p568_p3 = por %p567_p13, %p566_p10 }
  0x67   : > { %p569_p7 = pnand %p568_p3, %p562_p8 }
  0x6b   : > { %423 = vmatpush3.bf16.xpose.msra.mxu0 %v228_v20 }
  0x6c   : > { %424 = vmatprep.subr.bf16.mxu0 %v635_v0 }
  0x73   : > { %425 = vmatpush3.bf16.xpose.msra.mxu0 %v231_v26 }
  0x74   : > { %426 = vmatprep.subr.bf16.mxu0 %v635_v0 }
  0x7b   : > { %427 = vmatpush3.bf16.xpose.msra.mxu0 %v234_v32 }
  0x7c   : > { %428 = vmatprep.subr.bf16.mxu0 %v635_v0 }
  0x83   : > { %429 = vmatpush3.bf16.xpose.msra.mxu0 %v237_v38 }
  0x84   : > { %430 = vmatprep.subr.bf16.mxu0 %v635_v0 }
  0x8b   : > { %431 = vmatpush3.bf16.xpose.msra.mxu0 %v240_v44 }
  0x8c   : > { %432 = vmatprep.subr.bf16.mxu0 %v635_v0 }
  0x93   : > { %433 = vmatpush3.bf16.xpose.msra.mxu0 %v243_v48 }
  0x9a   : > { %435 = vmatmul.mubr.msk.bf16.vlgmr.msra.gmra.mrb[0].mxu0 %vm217_vm1, %v216_v50 }
 0x16d   : > { %v279_v53 = vpop.f32.mrb[0].mxu0 }
 0x16e   : > { %v436_v54 = vpop.f32.mrb[1].mxu0  ;;  %v288_v55 = vsel %vm287_vm2, %v279_v53, -1e+30 }
 0x16f   : > { %v282_v56 = vpop.f32.mrb[2].mxu0  ;;  %289 = vmax.xlane.f32.xlu0 %v288_v55 }
 0x170   : > { %v437_v57 = vpop.f32.mrb[3].mxu0 }
 0x1fc   : > { %v290_v58 = vpop.xlane.xlu0 %289 }
 0x1fd   : > { %v291_v59 = vrot.slane %v290_v58, 4 }
 0x1ff   : > { %v292_v60 = vmax.f32 %v290_v58, %v291_v59 }
 0x201   : > { %v293_v61 = vrot.slane %v292_v60, 2 }
 0x203   : > { %v294_v62 = vmax.f32 %v292_v60, %v293_v61 }
 0x205   : > { %v295_v63 = vrot.slane %v294_v62, 1 }
 0x207   : > { %v296_v0 = vmax.f32 %v294_v62, %v295_v63 }
 0x209   : > { %438 = vpush %v296_v0 }
 0x23a   : > { %s439_s22 = spop %438 }
 0x23b   : > { %v298_v1 = vstv %s439_s22 }
 0x23c   : > { %299 = vst [vmem:[%s173_s15] sm:$0xff] %v298_v1 }
 0x23d   : > { %572 = shalt.err (!%p569_p7)
}
 0x23e   : > { %s573_s7 = scalar_lea.hbm %s832_s30, 128  ;;  %s577_s25 = scalar_lea.hbm %s876_s2, 256 }
 0x23f   : > { %p574_p9 = scmp.ne.s32.totalorder %s832_s30, %s573_s7  ;;  %p578_p0 = scmp.lt.u32.totalorder %s832_s30, %s876_s2 }
 0x240   : > { %p579_p11 = scmp.lt.u32.totalorder %s577_s25, %s573_s7  ;;  %p581_p4 = scmp.lt.u32.totalorder %s573_s7, %s832_s30 }
 0x241   : > { %p575_p2 = pnand %p574_p9, %p744_p12 }
 0x242   : > { %p580_p1 = por %p579_p11, %p578_p0 }
 0x243   : > { %p576_p5 = pneg %p575_p2 }
 0x244   : > { %p582_p6 = por %p581_p4, %p580_p1 }
 0x246   : > { %p583_p8 = pnand %p582_p6, %p576_p5 }
 0x248   : > { %586 = shalt.err (!%p583_p8)
}
 0x249   : > { %446 = dma.vmem_to_hbm [thread:$0]  (%p744_p12), %s827_s17, 128, %s832_s30, %s301_s3  }
 0x24a PF: > { %s326_s19 = sand.u32 1, %s617_s9   ;;  %p891_p10 = scmp.ne.s32.totalorder %s881_s16, 0 }
 0x24b   : > { %p892_p13 = scmp.ge.s32.totalorder %s629_s12, 2  ;;  %s327_s29 = scalar_lea.sflag [#allocation4], %s326_s19 }
 0x24d   : > { %p457_p3 = pnand %p892_p13, %p891_p10 }
 0x24f   : > { %612 = dma.done.wait (!%p457_p3), %s327_s29, 128  }
 0x250   : > { %614 = vsyncadd (!%p457_p3), %s327_s29, 4294967168  ;;  %p16_p7 = scmp.ge.s32.totalorder %s709_s21, 4   ;;  %s893_s9 = smov %s621_s10 }
 0x251   : > { %s894_s10 = smov %s625_s11  ;;  %s895_s11 = smov %s740_s8 }
 0x252   : > { %s896_s12 = smov %s709_s21  ;;  %18 = sbr.rel (!%p16_p7) target bundleno = 6 (0x6), region = 77 }
 0x259   :  { %332 = vsyncpa [#allocation3], 1 }
 0x25a   :  { %334 = vsyncpa [#allocation3 + $0x1], 1 }
 0x25b   :  { %335 = vsyncpa [#allocation6], 1 }
 0x25c   :  { %336 = vsyncpa [#allocation4], 1 }
 0x25d   :  { %338 = vsyncpa [#allocation4 + $0x1], 1 }

// kernel: fast_attention.3
= control target key start
LH: loop header
LB: loop body
LE: loop exit
PB: predicated region body
PF: predicated region fallthrough
CT: control target
= control target key end

     0   :  { %s2076_s0 = inlined_call_operand.<no memory space> [shape: f32[1], index: 0, kind: input, shape index: {}]   ;;  %s2077_s1 = inlined_call_operand.hbm [shape: f32[2,8,32], index: 1, kind: input, shape index: {}]   ;;  %s2078_s2 = inlined_call_operand.hbm [shape: f32[2,8,32], index: 2, kind: input, shape index: {}]   ;;  %s2079_s3 = inlined_call_operand.hbm [shape: f32[2,8,32], index: 3, kind: input, shape index: {}]   ;;  %s2080_s4 = inlined_call_operand.hbm [shape: f32[128,32], index: 4, kind: input, shape index: {}]   ;;  %s2081_s5 = inlined_call_operand.hbm [shape: f32[2,8,32], index: 5, kind: output, shape index: {0}]   ;;  %s2082_s6 = inlined_call_operand.hbm [shape: f32[2,8,8], index: 6, kind: output, shape index: {1}]  }
   0x1   :  { %2102 = sst [smem:[#allocation29_spill]] %s2078_s2 }
   0x2   :  { %2103 = sst [smem:[#allocation30_spill]] %s2081_s5 }
   0x3   :  { %12 = sst [smem:[#allocation5]] %s2076_s0 }
   0x4   :  { %13 = vsyncpa [#allocation7], 0 }
   0x5   :  { %15 = vsyncpa [#allocation7 + $0x1], 0 }
   0x6   :  { %16 = vsyncpa [#allocation10], 0 }
   0x7   :  { %18 = vsyncpa [#allocation10 + $0x1], 0 }
   0x8   :  { %19 = vsyncpa [#allocation13], 0 }
   0x9   :  { %20 = vsyncpa [#allocation8], 0 }
   0xa   :  { %22 = vsyncpa [#allocation8 + $0x1], 0 }
   0xb   :  { %23 = vsyncpa [#allocation16], 0 }
   0xc   :  { %25 = vsyncpa [#allocation16 + $0x1], 0  ;;  %s1632_s23 = smov 0   ;;  %s1634_s24 = smov 0  }
   0xd   :  { %s1636_s25 = smov 0   ;;  %s1638_s26 = smov 0  }
   0xe   :  { %s1640_s27 = smov 0   ;;  %s1642_s0 = smov 0  }
   0xf LB: > { %2104 = sst [smem:[#allocation22_spill]] %s1562_s23  ;;  %s43_s28 = sadd.s32 1, %s1578_s27  ;;  %s1582_s0 = sphi %s1642_s0, %s31_s0   ;;  %s1578_s27 = sphi %s1640_s27, %s2138_s27   ;;  %s1574_s26 = sphi %s1638_s26, %s2137_s26   ;;  %s1570_s25 = sphi %s1636_s25, %s2141_s25   ;;  %s1566_s24 = sphi %s1634_s24, %s2140_s24   ;;  %s1562_s23 = sphi %s1632_s23, %s2139_s23  }
  0x10   : > { %2105 = sst [smem:[#allocation23_spill]] %s1578_s27  ;;  %s73_s29 = sadd.s32 1, %s1570_s25 }
  0x11   : > { %2106 = sst [smem:[#allocation24_spill]] %s1582_s0  ;;  %p45_p0 = scmp.ge.s32.totalorder %s43_s28, 2 }
  0x12   : > { %p2083_p1 = scmp.ne.s32.totalorder %s1570_s25, %s1566_s24  ;;  %p81_p2 = scmp.eq.s32.totalorder %s1582_s0, 0 }
  0x13   : > { %s2143_s28 = smov (%p45_p0, %s43_s28), 0  ;;  %p1279_p5 = scmp.lt.s32.totalorder %s1582_s0, 2 }
  0x14   : > { %2107 = sst [smem:[#allocation25_spill]] %s2143_s28  ;;  %p82_p4 = por %p81_p2, %p2083_p1 }
  0x15   : > { %s68_s30 = ssub.s32 %s1578_s27, %s2143_s28  ;;  %s2084_s7 = sand.u32 1, %s1570_s25  }
  0x16   : > { %p71_p6 = scmp.eq.s32.totalorder %s68_s30, 0  ;;  %s1679_s8 = sshll.u32 %s2084_s7, 3 }
  0x17   : > { %s1682_s9 = sshll.u32 %s1578_s27, 7  ;;  %p1684_p7 = pnand %p1279_p5, %p82_p4 }
  0x18   : > { %s1689_s11 = scalar_select %p71_p6, %s1570_s25, %s73_s29  }
  0x19   : > { %s2108_s10 = scalar_select %p1684_p7, 1, 0 }
  0x1a   : > { %2109 = sst [smem:[#allocation26_spill]] %s1689_s11  ;;  %s274_s12 = sand.u32 1, %s1582_s0  }
  0x1b   : > { %s2110_s2 = sld [smem:[#allocation29_spill]]  ;;  %s278_s16 = scalar_lea.vmem [#allocation9], %s1679_s8 }
  0x1c   : > { %s285_s17 = sshll.u32 %s278_s16, 4  ;;  %s1701_s18 = scalar_lea.sflag [#allocation10], %s274_s12  ;;  %s1699_s17 = int_to_ptr.vmem [resolvable:$true] %s285_s17 }
  0x1d   : > { %p1707_p9 = pneg %p1684_p7 }
  0x1f   : > { %s2111_s20 = scalar_select %p1707_p9, 1, 0 }
  0x21   : > { %s1696_s15 = scalar_lea.hbm %s2110_s2, %s1682_s9  ;;  %s1347_s29 = scalar_lea.hbm %s2110_s2, 256 }
  0x22   : > { %s1342_s19 = scalar_lea.hbm %s1696_s15, 128  ;;  %p1348_p12 = scmp.lt.u32.totalorder %s1696_s15, %s2110_s2 }
  0x23   : > { %p1343_p8 = scmp.ne.s32.totalorder %s1696_s15, %s1342_s19  ;;  %p1349_p13 = scmp.lt.u32.totalorder %s1347_s29, %s1342_s19 }
  0x24   : > { %p1351_p2 = scmp.lt.u32.totalorder %s1342_s19, %s1696_s15 }
  0x25   : > { %p1345_p10 = pnand %p1707_p9, %p1343_p8  ;;  %p1350_p0 = por %p1349_p13, %p1348_p12 }
  0x27   : > { %p1346_p11 = pneg %p1345_p10  ;;  %p1352_p4 = por %p1351_p2, %p1350_p0 }
  0x29   : > { %p1353_p5 = pnand %p1352_p4, %p1346_p11 }
  0x2b   : > { %1356 = shalt.err (!%p1353_p5)
}
  0x2c   : > { %s1357_s12 = scalar_lea.vmem %s1699_s17, 128  ;;  %s1584_s14 = smov [#allocation9]  }
  0x2d   : > { %p1358_p6 = scmp.ne.s32.totalorder %s1699_s17, %s1357_s12  ;;  %s1362_s16 = sshll.u32 %s1584_s14, 4  ;;  %s1363_s16 = int_to_ptr.vmem [resolvable:$false] %s1362_s16 }
  0x2e   : > { %s1364_s21 = scalar_lea.vmem %s1363_s16, 256  ;;  %p1365_p3 = scmp.lt.s32.totalorder %s1699_s17, %s1363_s16 }
  0x2f   : > { %p1360_p8 = pnand %p1358_p6, %p1707_p9  ;;  %p1366_p1 = scmp.lt.s32.totalorder %s1364_s21, %s1357_s12 }
  0x31   : > { %p1361_p10 = pneg %p1360_p8  ;;  %p1367_p12 = por %p1366_p1, %p1365_p3 }
  0x33   : > { %p1368_p13 = pnand %p1367_p12, %p1361_p10 }
  0x35   : > { %1371 = shalt.err (!%p1368_p13)
}
  0x36   : > { %1267 = dma.hbm_to_vmem [thread:$0]  (!%p1684_p7), %s1696_s15, 128, %s1699_s17, %s1701_s18  }
  0x37   : > { %s1732_s19 = sadd.s32 4294967295, %s1582_s0   ;;  %s1080_s22 = sadd.s32 4294967294, %s1582_s0  }
  0x38   : > { %p86_p1 = scmp.ne.s32.totalorder %s1566_s24, %s1562_s23  ;;  %p2089_p3 = scmp.eq.s32.totalorder %s1732_s19, 0 }
  0x39   : > { %p185_p11 = scmp.eq.s32.totalorder %s1732_s19, 1  ;;  %p191_p0 = scmp.eq.s32.totalorder %s1080_s22, 1 }
  0x3a   : > { %p1081_p2 = scmp.ge.s32.totalorder %s1582_s0, 1  ;;  %p1742_p4 = por %p2089_p3, %p86_p1 }
  0x3b   : > { %p2113_p5 = scmp.ne.s32.totalorder %s1570_s25, %s1566_s24  ;;  %p1753_p8 = por %p191_p0, %p86_p1 }
  0x3c   : > { %s2112_s29 = scalar_select %p1742_p4, 1, 0 }
  0x3d   : > { %p1749_p6 = por %p185_p11, %p2113_p5  ;;  %p226_p10 = scmp.lt.s32.totalorder %s1582_s0, 3 }
  0x3e   : > { %s2116_s17 = scalar_select %p1753_p8, 1, 0 }
  0x3f   : > { %s2114_s15 = scalar_select %p1749_p6, 1, 0 }
  0x40   : > { %2117 = sst [smem:[#allocation28_spill]] %s2116_s17  ;;  %p1758_p12 = pnand %p1081_p2, %p226_p10 }
  0x41   : > { %2115 = sst [smem:[#allocation27_spill]] %s2114_s15  ;;  %s1585_s13 = smov [#allocation12]  }
  0x42   : > { %s2118_s30 = scalar_select %p1758_p12, 1, 0 }
  0x43   : > { %s241_s12 = sshll.u32 %s1585_s13, 4  ;;  %p1257_p13 = pneg %p1758_p12  ;;  %s1762_s12 = int_to_ptr.vmem [resolvable:$true] %s241_s12 }
  0x44   : > { %s1776_s22 = scalar_lea.hbm %s2077_s1, %s1682_s9  ;;  %s259_s7 = scalar_lea.vmem [#allocation6], %s1679_s8 }
  0x45   : > { %p1768_p11 = pnand %p1257_p13, %p2089_p3  ;;  %s267_s2 = sshll.u32 %s259_s7, 4  ;;  %s1779_s2 = int_to_ptr.vmem [resolvable:$true] %s267_s2 }
  0x46   : > { %s1372_s27 = scalar_lea.hbm %s2080_s4, 2048 }
  0x47   : > { %p1373_p1 = scmp.ne.s32.totalorder %s2080_s4, %s1372_s27  ;;  %p1374_p0 = pneg %p1768_p11 }
  0x48   : > { %p1379_p10 = scmp.lt.u32.totalorder %s1372_s27, %s2080_s4 }
  0x49   : > { %p1375_p2 = pnand %p1374_p0, %p1373_p1 }
  0x4b   : > { %p1376_p5 = pneg %p1375_p2 }
  0x4d   : > { %p1381_p13 = pnand %p1379_p10, %p1376_p5 }
  0x4f   : > { %1384 = shalt.err (!%p1381_p13)
}
  0x50   : > { %s1385_s7 = scalar_lea.vmem %s1762_s12, 2048  ;;  %p1393_p4 = scmp.lt.s32.totalorder %s1762_s12, %s1762_s12 }
  0x51   : > { %p1386_p3 = scmp.ne.s32.totalorder %s1762_s12, %s1385_s7  ;;  %p1394_p12 = scmp.lt.s32.totalorder %s1385_s7, %s1385_s7 }
  0x53   : > { %p1388_p8 = pnand %p1386_p3, %p1374_p0  ;;  %p1395_p7 = por %p1394_p12, %p1393_p4 }
  0x55   : > { %p1389_p6 = pneg %p1388_p8 }
  0x57   : > { %p1396_p9 = pnand %p1395_p7, %p1389_p6 }
  0x59   : > { %1399 = shalt.err (!%p1396_p9)
}
  0x5a   : > { %s1586_s0 = smov 128   ;;  %s1587_s27 = smov 8  }
  0x5b   : > { %1260 = dma.hbm_to_vmem [thread:$0]  (!%p1768_p11), %s2080_s4, 2048, %s1762_s12, [#allocation13], %s1586_s0, %s1586_s0, %s1587_s27  }
  0x5c   : > { %s2120_s13 = sand.u32 1, %s1570_s25   ;;  %s1400_s21 = scalar_lea.hbm %s1776_s22, 128 }
  0x5d   : > { %s256_s16 = scalar_lea.sflag [#allocation7], %s2120_s13  ;;  %p1401_p7 = scmp.ne.s32.totalorder %s1776_s22, %s1400_s21 }
  0x5e   : > { %p2121_p9 = scmp.ne.s32.totalorder %s2111_s20, 0  ;;  %s1405_s23 = scalar_lea.hbm %s2077_s1, 256 }
  0x5f   : > { %p1406_p6 = scmp.lt.u32.totalorder %s1776_s22, %s2077_s1  ;;  %p1407_p8 = scmp.lt.u32.totalorder %s1405_s23, %s1400_s21 }
  0x60   : > { %p1403_p3 = pnand %p1401_p7, %p2121_p9  ;;  %p1409_p1 = scmp.lt.u32.totalorder %s1400_s21, %s1776_s22 }
  0x61   : > { %p1408_p12 = por %p1407_p8, %p1406_p6 }
  0x62   : > { %p1404_p4 = pneg %p1403_p3 }
  0x63   : > { %p1410_p0 = por %p1409_p1, %p1408_p12 }
  0x65   : > { %p1411_p11 = pnand %p1410_p0, %p1404_p4 }
  0x67   : > { %1414 = shalt.err (!%p1411_p11)
}
  0x68   : > { %s1415_s12 = scalar_lea.vmem %s1779_s2, 128  ;;  %s1588_s17 = smov [#allocation6]  }
  0x69   : > { %p1416_p2 = scmp.ne.s32.totalorder %s1779_s2, %s1415_s12  ;;  %s1420_s14 = sshll.u32 %s1588_s17, 4  ;;  %s1421_s14 = int_to_ptr.vmem [resolvable:$false] %s1420_s14 }
  0x6a   : > { %s1422_s5 = scalar_lea.vmem %s1421_s14, 256  ;;  %p1423_p13 = scmp.lt.s32.totalorder %s1779_s2, %s1421_s14 }
  0x6b   : > { %p1418_p5 = pnand %p1416_p2, %p2121_p9  ;;  %p1424_p7 = scmp.lt.s32.totalorder %s1422_s5, %s1415_s12 }
  0x6d   : > { %p1419_p10 = pneg %p1418_p5  ;;  %p1425_p3 = por %p1424_p7, %p1423_p13 }
  0x6f   : > { %p1426_p6 = pnand %p1425_p3, %p1419_p10 }
  0x71   : > { %1429 = shalt.err (!%p1426_p6)
}
  0x72   : > { %p2122_p4 = scmp.ne.s32.totalorder %s2108_s10, 0  ;;  %s1829_s0 = scalar_lea.hbm %s2079_s3, %s1682_s9 }
  0x73   : > { %s296_s27 = scalar_lea.vmem [#allocation11], %s1679_s8  ;;  %s1430_s11 = scalar_lea.hbm %s1829_s0, 128 }
  0x74   : > { %1264 = dma.hbm_to_vmem [thread:$0]  (!%p2122_p4), %s1776_s22, 128, %s1779_s2, %s256_s16  }
  0x75   : > { %s303_s28 = sshll.u32 %s296_s27, 4  ;;  %p1431_p8 = scmp.ne.s32.totalorder %s1829_s0, %s1430_s11  ;;  %s304_s28 = int_to_ptr.vmem [resolvable:$true] %s303_s28 }
  0x76   : > { %s1435_s2 = scalar_lea.hbm %s2079_s3, 256  ;;  %p1436_p0 = scmp.lt.u32.totalorder %s1829_s0, %s2079_s3 }
  0x77   : > { %p1433_p12 = pnand %p1431_p8, %p2121_p9  ;;  %p1437_p11 = scmp.lt.u32.totalorder %s1435_s2, %s1430_s11 }
  0x78   : > { %p1439_p5 = scmp.lt.u32.totalorder %s1430_s11, %s1829_s0 }
  0x79   : > { %p1434_p1 = pneg %p1433_p12  ;;  %p1438_p2 = por %p1437_p11, %p1436_p0 }
  0x7b   : > { %p1440_p10 = por %p1439_p5, %p1438_p2 }
  0x7d   : > { %p1441_p13 = pnand %p1440_p10, %p1434_p1 }
  0x7f   : > { %1444 = shalt.err (!%p1441_p13)
}
  0x80   : > { %s1445_s8 = scalar_lea.vmem %s304_s28, 128  ;;  %s1589_s9 = smov [#allocation11]  }
  0x81   : > { %p1446_p7 = scmp.ne.s32.totalorder %s304_s28, %s1445_s8  ;;  %s1450_s7 = sshll.u32 %s1589_s9, 4  ;;  %s1451_s7 = int_to_ptr.vmem [resolvable:$false] %s1450_s7 }
  0x82   : > { %s1452_s12 = scalar_lea.vmem %s1451_s7, 256  ;;  %p1453_p8 = scmp.lt.s32.totalorder %s304_s28, %s1451_s7 }
  0x83   : > { %p1448_p3 = pnand %p1446_p7, %p2121_p9  ;;  %p1454_p12 = scmp.lt.s32.totalorder %s1452_s12, %s1445_s8 }
  0x85   : > { %p1449_p6 = pneg %p1448_p3  ;;  %p1455_p4 = por %p1454_p12, %p1453_p8 }
  0x87   : > { %p1456_p0 = pnand %p1455_p4, %p1449_p6 }
  0x89   : > { %1459 = shalt.err (!%p1456_p0)
}
  0x8a   : > { %p2123_p11 = scmp.ne.s32.totalorder %s2108_s10, 0  ;;  %p2124_p1 = scmp.ne.s32.totalorder %s2118_s30, 0 }
  0x8b   : > { %s1853_s20 = sand.u32 (!%p2124_p1), 1, %s1566_s24   ;;  %p2125_p9 = scmp.ne.s32.totalorder (!%p2124_p1), %s2112_s29, 0 }
  0x8c   : > { %1270 = dma.hbm_to_vmem [thread:$0]  (!%p2123_p11), %s1829_s0, 128, %s304_s28, %s1701_s18  }
  0x8d   : > { %312 = sbr.rel (%p2124_p1) target bundleno = 1258 (0x4ea), region = 40  ;;  %s1856_s17 = sshll.u32 (!%p2124_p1), %s1853_s20, 3 }
  0x8e   : > { %s315_s14 = scalar_lea.sflag (!%p2124_p1), [#allocation7], %s1853_s20  ;;  %s318_s5 = scalar_lea.vmem (!%p2124_p1), [#allocation6], %s1856_s17 }
  0x94   : > { %1541 = dma.done.wait (%p2125_p9), %s315_s14, 128  }
  0x95   : > { %1543 = vsyncadd (%p2125_p9), %s315_s14, 4294967168  ;;  %s323_s10 = sand.u32 1, %s1732_s19   ;;  %s327_s30 = scalar_lea.vmem [#allocation9], %s1856_s17 }
  0x96   : > { %s324_s18 = scalar_lea.sflag [#allocation10], %s323_s10 }
  0x97   : > { %1545 = dma.done.wait (%p2125_p9), %s324_s18, 256  }
  0x98   : > { %1547 = vsyncadd (%p2125_p9), %s324_s18, 4294967040  ;;  %s336_s23 = scalar_lea.vmem [#allocation11], %s1856_s17  ;;  %p2126_p4 = scmp.eq.s32.totalorder %s1732_s19, 0 }
  0x9a   : > { %1549 = dma.done.wait (%p2126_p4), [#allocation13], 2048   ;;  %p2127_p2 = pmov %p2126_p4 }
  0x9b   : > { %v1590_v0 = vmov 0.0   ;;  %vm1591_vm0 = vmmov 0   ;;  %v385_v1 = vld [vmem:[#allocation12] sm:$0xff]  ;;  %v386_v2 = vld [vmem:[#allocation12 + $0x8] sm:$0xff]  ;;  %v387_v3 = vld [vmem:[#allocation12 + $0x10] sm:$0xff]  ;;  %vm431_vm1 = vcmask 261120   ;;  %v504_v56 = vlaneseq }
  0x9c   : > { %1551 = vsyncadd (%p2127_p2), [#allocation13], 4294965248  ;;  %1158 = vmatprep.subr.bf16.mxu0 %v1590_v0  ;;  %1174 = vmatprep.mubr.msk.bf16.mxu0 %vm1591_vm0, %v1590_v0  ;;  %v401_v4 = vmul.f32 0.4204482, %v385_v1  ;;  %v402_v5 = vmul.f32 0.4204482, %v386_v2 }
  0x9d   : > { %v388_v6 = vld [vmem:[#allocation12 + $0x18] sm:$0xff]  ;;  %v403_v8 = vmul.f32 0.4204482, %v387_v3  ;;  %v389_v12 = vld [vmem:[#allocation12 + $0x20] sm:$0xff]  ;;  %v390_v13 = vld [vmem:[#allocation12 + $0x28] sm:$0xff]  ;;  %vm569_vm2 = vcmask 1043456  }
  0x9e   : > { %v417_v7 = vpack.c.bf16 %v402_v5, %v401_v4  ;;  %v404_v9 = vmul.f32 0.4204482, %v388_v6  ;;  %v429_v14 = vld [vmem:[%s327_s30] sm:$0xff]  ;;  %v405_v17 = vmul.f32 0.4204482, %v389_v12  ;;  %v391_v21 = vld [vmem:[#allocation12 + $0x30] sm:$0xff] }
  0x9f   : > { %v499_v15 = vmul.f32 %v429_v14, %v429_v14  ;;  %v406_v18 = vmul.f32 0.4204482, %v390_v13  ;;  %v392_v22 = vld [vmem:[#allocation12 + $0x38] sm:$0xff]  ;;  %v407_v24 = vmul.f32 0.4204482, %v391_v21  ;;  %v393_v27 = vld [vmem:[#allocation12 + $0x40] sm:$0xff]  ;;  %v430_v52 = vpack.c.bf16 %v429_v14, %v429_v14 }
  0xa0   : > { %v1879_v10 = vsel %vm431_vm1, %v417_v7, 0  ;;  %v418_v11 = vpack.c.bf16 %v404_v9, %v403_v8  ;;  %v408_v25 = vmul.f32 0.4204482, %v392_v22  ;;  %v394_v28 = vld [vmem:[#allocation12 + $0x48] sm:$0xff]  ;;  %v409_v30 = vmul.f32 0.4204482, %v393_v27 }
  0xa1   : > { %1159 = vmatpush3.bf16.xpose.msra.mxu0 %v1879_v10  ;;  %v500_v19 = vsel %vm431_vm1, %v499_v15, 0.0  ;;  %v419_v20 = vpack.c.bf16 %v406_v18, %v405_v17  ;;  %v410_v31 = vmul.f32 0.4204482, %v394_v28  ;;  %v395_v33 = vld [vmem:[#allocation12 + $0x50] sm:$0xff]  ;;  %v396_v34 = vld [vmem:[#allocation12 + $0x58] sm:$0xff]  ;;  %v397_v39 = vld [vmem:[#allocation12 + $0x60] sm:$0xff] }
  0xa2   : > { %1160 = vmatprep.subr.bf16.mxu0 %v1590_v0  ;;  %v1884_v16 = vsel %vm431_vm1, %v418_v11, 0  ;;  %501 = vadd.xlane.f32.xlu0 %v500_v19  ;;  %v420_v26 = vpack.c.bf16 %v408_v25, %v407_v24  ;;  %v411_v36 = vmul.f32 0.4204482, %v395_v33  ;;  %v412_v37 = vmul.f32 0.4204482, %v396_v34  ;;  %v398_v40 = vld [vmem:[#allocation12 + $0x68] sm:$0xff] }
  0xa3   : > { %v1890_v23 = vsel %vm431_vm1, %v419_v20, 0  ;;  %v421_v32 = vpack.c.bf16 %v410_v31, %v409_v30  ;;  %v413_v42 = vmul.f32 0.4204482, %v397_v39  ;;  %v414_v43 = vmul.f32 0.4204482, %v398_v40  ;;  %v399_v45 = vld [vmem:[#allocation12 + $0x70] sm:$0xff] }
  0xa4   : > { %v1895_v29 = vsel %vm431_vm1, %v420_v26, 0  ;;  %v422_v38 = vpack.c.bf16 %v412_v37, %v411_v36  ;;  %v400_v46 = vld [vmem:[#allocation12 + $0x78] sm:$0xff]  ;;  %v415_v48 = vmul.f32 0.4204482, %v399_v45  ;;  %s508_s19 = sld [smem:[#allocation5]]  ;;  %v1925_v57 = vand.u32 127, %v504_v56 }
  0xa5   : > { %v1900_v35 = vsel %vm431_vm1, %v421_v32, 0  ;;  %v423_v44 = vpack.c.bf16 %v414_v43, %v413_v42  ;;  %v416_v49 = vmul.f32 0.4204482, %v400_v46  ;;  %v526_v53 = vld [vmem:[%s336_s23] sm:$0xff]  ;;  %vm544_vm4 = vcmask 64512   ;;  %s1116_s29 = sshll.u32 %s1574_s26, 7 }
  0xa6   : > { %v1905_v41 = vsel %vm431_vm1, %v422_v38, 0  ;;  %v527_v54 = vpack.c.bf16 %v526_v53, %v526_v53  ;;  %vm506_vm3 = vcmp.lt.s32.totalorder %v1925_v57, 110  ;;  %v686_v20 = vld [vmem:[%s318_s5] sm:$0xff]  ;;  %s383_s15 = scalar_lea.vmem [#allocation15], %s1856_s17  ;;  %s376_s27 = scalar_lea.vmem [#allocation14], %s1856_s17 }
  0xa7   : > { %v1910_v47 = vsel %vm431_vm1, %v423_v44, 0  ;;  %v424_v50 = vpack.c.bf16 %v416_v49, %v415_v48  ;;  %v756_v21 = vmul.f32 %v686_v20, %v686_v20  ;;  %vm1107_vm5 = vmpackc.low %vm506_vm3, %vm506_vm3  ;;  %s913_s0 = sshll.u32 %s383_s15, 4  ;;  %s899_s28 = sshll.u32 %s376_s27, 4  ;;  %s1996_s0 = int_to_ptr.vmem [resolvable:$true] %s913_s0  ;;  %s2004_s28 = int_to_ptr.vmem [resolvable:$true] %s899_s28 }
  0xa8   : > { %1242 = vmatprep.subr.msk.bf16.mxu1 %vm569_vm2, %v527_v54  ;;  %v571_v55 = vsel %vm569_vm2, %v527_v54, 0  ;;  %s1994_s21 = scalar_lea.hbm %s2082_s6, %s1116_s29  ;;  %s2128_s2 = sld [smem:[#allocation27_spill]] }
  0xa9   : > { %1161 = vmatpush3.bf16.xpose.msra.mxu0 %v1884_v16  ;;  %v1915_v51 = vsel %vm431_vm1, %v424_v50, 0  ;;  %1179 = vmatpush3.bf16.msra.mxu1 %v571_v55  ;;  %v757_v22 = vsel %vm431_vm1, %v756_v21, 0.0  ;;  %s2129_s16 = sld [smem:[#allocation30_spill]]  ;;  %s885_s9 = scalar_lea.sflag [#allocation16], %s1853_s20 }
  0xaa   : > { %1162 = vmatprep.subr.bf16.mxu0 %v1590_v0  ;;  %1196 = vmatprep.subr.bf16.mxu1 %v1590_v0  ;;  %v510_v62 = vstv %s508_s19  ;;  %s1460_s7 = scalar_lea.vmem %s1996_s0, 128  ;;  %s1592_s12 = smov [#allocation15]  }
  0xab   : > { %758 = vadd.xlane.f32.xlu1 %v757_v22  ;;  %p1461_p5 = scmp.ne.s32.totalorder %s1996_s0, %s1460_s7  ;;  %s1464_s14 = sshll.u32 %s1592_s12, 4  ;;  %s1465_s14 = int_to_ptr.vmem [resolvable:$false] %s1464_s14 }
  0xac   : > { %s1466_s5 = scalar_lea.vmem %s1465_s14, 256  ;;  %p1467_p3 = scmp.lt.s32.totalorder %s1996_s0, %s1465_s14 }
  0xad   : > { %p1468_p6 = scmp.lt.s32.totalorder %s1466_s5, %s1460_s7 }
  0xae   : > { %p2130_p10 = scmp.ne.s32.totalorder %s2128_s2, 0 }
  0xaf   : > { %s2002_s8 = scalar_lea.hbm %s2129_s16, %s1116_s29  ;;  %p1469_p8 = por %p1468_p6, %p1467_p3 }
  0xb0   : > { %p1462_p13 = pnand %p1461_p5, %p2130_p10 }
  0xb1   : > { %1163 = vmatpush3.bf16.xpose.msra.mxu0 %v1890_v23 }
  0xb2   : > { %1164 = vmatprep.subr.bf16.mxu0 %v1590_v0  ;;  %p1463_p7 = pneg %p1462_p13 }
  0xb4   : > { %p1470_p12 = pnand %p1469_p8, %p1463_p7 }
  0xb9   : > { %1165 = vmatpush3.bf16.xpose.msra.mxu0 %v1895_v29 }
  0xba   : > { %1166 = vmatprep.subr.bf16.mxu0 %v1590_v0 }
  0xc1   : > { %1167 = vmatpush3.bf16.xpose.msra.mxu0 %v1900_v35 }
  0xc2   : > { %1168 = vmatprep.subr.bf16.mxu0 %v1590_v0 }
  0xc9   : > { %1169 = vmatpush3.bf16.xpose.msra.mxu0 %v1905_v41 }
  0xca   : > { %1170 = vmatprep.subr.bf16.mxu0 %v1590_v0 }
  0xd1   : > { %1171 = vmatpush3.bf16.xpose.msra.mxu0 %v1910_v47 }
  0xd2   : > { %1172 = vmatprep.subr.bf16.mxu0 %v1590_v0 }
  0xd9   : > { %1173 = vmatpush3.bf16.xpose.msra.mxu0 %v1915_v51 }
  0xda   : > { %1216 = vmatprep.subr.bf16.mxu0 %v1590_v0 }
  0xe0   : > { %1175 = vmatmul.mubr.msk.bf16.vlgmr.msra.gmra.mrb[0].mxu0 %vm431_vm1, %v430_v52 }
  0xe1   : > { %1218 = vmatprep.mubr.msk.bf16.mxu0 %vm1591_vm0, %v1590_v0 }
 0x12f   : > { %v502_v58 = vpop.xlane.xlu0 %501 }
 0x130   : > { %v503_v59 = vmul.f32 0.088388346, %v502_v58 }
 0x1b3   : > { %v493_v60 = vpop.f32.mrb[0].mxu0 }
 0x1b4   : > { %v507_v61 = vsel %vm506_vm3, %v493_v60, -1e+30  ;;  %v1176_v63 = vpop.f32.mrb[1].mxu0 }
 0x1b5   : > { %v509_v1 = vsub.f32 %v507_v61, %v503_v59  ;;  %v496_v2 = vpop.f32.mrb[2].mxu0 }
 0x1b6   : > { %v1177_v3 = vpop.f32.mrb[3].mxu0 }
 0x1b7   : > { %v511_v4 = vsub.f32 %v509_v1, %v510_v62 }
 0x1b9   : > { %v512_v5 = vmul.f32 1.442695, %v511_v4 }
 0x1bb   : > { %1336 = vpow2.f32 %v512_v5  ;;  %v759_v5 = vpop.xlane.xlu1 %758 }
 0x1c5   : > { %v1337_v6 = vpop.eup %1336 }
 0x1c6   : > { %v514_v7 = vadd.f32 0.0001, %v1337_v6  ;;  %v760_v6 = vmul.f32 0.088388346, %v759_v5 }
 0x1c8   : > { %v515_v8 = vmul.f32 0.09534626, %v514_v7 }
 0x1ca   : > { %v516_v9 = vsel %vm506_vm3, %v515_v8, 0.0 }
 0x1cb   : > { %v517_v11 = vpack.c.bf16 %v516_v9, %v516_v9  ;;  %v519_v12 = vrot.slane %v516_v9, 4 }
 0x1cd   : > { %v520_v13 = vadd.f32 %v519_v12, %v516_v9  ;;  %528 = vxpose.xlu0.c.b16.start.end [1/1] (short) %v517_v11, 128  ;;  %518 = vst [vmem:[#allocation2] sm:$0xf] %v517_v11 }
 0x1cf   : > { %v521_v14 = vrot.slane %v520_v13, 2 }
 0x1d1   : > { %v522_v15 = vadd.f32 %v521_v14, %v520_v13 }
 0x1d3   : > { %v523_v17 = vrot.slane %v522_v15, 1 }
 0x1d4   : > { %v775_v18 = vld [vmem:[#allocation2] sm:$0xf] }
 0x1d5   : > { %v524_v19 = vadd.f32 %v523_v17, %v522_v15  ;;  %1217 = vmatpush3.bf16.xpose.msra.mxu0 %v775_v18 }
 0x1d7   : > { %525 = vst [vmem:[#allocation4] sm:$0x1] %v524_v19 }
 0x1de   : > { %v1110_v17 = vld [vmem:[#allocation4] ss:$0 sm:$0xff] }
 0x233   : > { %v536_v24 = vpop.trf.xlu0 }
 0x234   : > { %1180 = vmatprep.mubr.msk.bf16.mxu1 %vm544_vm4, %v536_v24 }
 0x237   : > { %v537_v25 = vpop.trf.xlu0 }
 0x238   : > { %1181 = vmatmul.mubr.msk.bf16.vlgmr.msra.gmra.mrb[0].mxu1 %vm544_vm4, %v537_v25 }
 0x239   : > { %1197 = vmatpush3.bf16.xpose.msra.mxu1 %v1879_v10 }
 0x23a   : > { %1198 = vmatprep.subr.bf16.mxu1 %v1590_v0 }
 0x23b   : > { %v538_v26 = vpop.trf.xlu0 }
 0x23c   : > { %1184 = vmatprep.mubr.msk.bf16.mxu1 %vm544_vm4, %v538_v26 }
 0x23f   : > { %v539_v27 = vpop.trf.xlu0 }
 0x240   : > { %1185 = vmatmul.mubr.msk.bf16.gmra.mrb[4].mxu1 %vm544_vm4, %v539_v27 }
 0x241   : > { %1199 = vmatpush3.bf16.xpose.msra.mxu1 %v1884_v16  ;;  %v687_v16 = vpack.c.bf16 %v686_v20, %v686_v20 }
 0x242   : > { %1200 = vmatprep.subr.bf16.mxu1 %v1590_v0 }
 0x243   : > { %v540_v28 = vpop.trf.xlu0 }
 0x244   : > { %1188 = vmatprep.mubr.msk.bf16.mxu1 %vm544_vm4, %v540_v28 }
 0x247   : > { %v541_v30 = vpop.trf.xlu0 }
 0x248   : > { %1189 = vmatmul.mubr.msk.bf16.gmra.mrb[8].mxu1 %vm544_vm4, %v541_v30 }
 0x249   : > { %1201 = vmatpush3.bf16.xpose.msra.mxu1 %v1890_v23 }
 0x24a   : > { %1202 = vmatprep.subr.bf16.mxu1 %v1590_v0 }
 0x24b   : > { %v542_v10 = vpop.trf.xlu0 }
 0x24c   : > { %1192 = vmatprep.mubr.msk.bf16.mxu1 %vm544_vm4, %v542_v10 }
 0x24f   : > { %v543_v31 = vpop.trf.xlu0 }
 0x250   : > { %1193 = vmatmul.mubr.msk.bf16.gmra.mrb[12].mxu1 %vm544_vm4, %v543_v31 }
 0x251   : > { %1203 = vmatpush3.bf16.xpose.msra.mxu1 %v1895_v29  ;;  %1212 = vmatprep.mubr.msk.bf16.mxu1 %vm1591_vm0, %v1590_v0 }
 0x252   : > { %1204 = vmatprep.subr.bf16.mxu1 %v1590_v0 }
 0x259   : > { %1205 = vmatpush3.bf16.xpose.msra.mxu1 %v1900_v35 }
 0x25a   : > { %1206 = vmatprep.subr.bf16.mxu1 %v1590_v0 }
 0x261   : > { %1207 = vmatpush3.bf16.xpose.msra.mxu1 %v1905_v41 }
 0x262   : > { %1208 = vmatprep.subr.bf16.mxu1 %v1590_v0 }
 0x269   : > { %1209 = vmatpush3.bf16.xpose.msra.mxu1 %v1910_v47 }
 0x26a   : > { %1210 = vmatprep.subr.bf16.mxu1 %v1590_v0 }
 0x271   : > { %1211 = vmatpush3.bf16.xpose.msra.mxu1 %v1915_v51 }
 0x272   : > { %1222 = vmatprep.subr.bf16.mxu1 %v1590_v0 }
 0x278   : > { %1213 = vmatmul.mubr.msk.bf16.vlgmr.msra.gmra.mrb[16].mxu1 %vm431_vm1, %v687_v16 }
 0x279   : > { %1238 = vmatprep.mubr.msk.bf16.mxu1 %vm1591_vm0, %v1590_v0 }
 0x30b   : > { %v1182_v23 = vpop.f32.mrb[0].mxu1 }
 0x30c   : > { %v607_v29 = vpop.f32.mrb[1].mxu1 }
 0x30d   : > { %v1183_v32 = vpop.f32.mrb[2].mxu1 }
 0x30e   : > { %v671_v33 = vpack.c.bf16 %v1183_v32, %v1182_v23  ;;  %v610_v34 = vpop.f32.mrb[3].mxu1 }
 0x30f   : > { %v670_v35 = vpack.c.bf16 %v610_v34, %v607_v29 }
 0x310   : > { %679 = vst.msk [vmem:[#allocation3 + $0x8] sm:$0xff] %vm431_vm1, %v671_v33 }
 0x311   : > { %678 = vst.msk [vmem:[#allocation3] sm:$0xff] %vm431_vm1, %v670_v35 }
 0x313   : > { %v1186_v36 = vpop.f32.mrb[4].mxu1 }
 0x314   : > { %v623_v37 = vpop.f32.mrb[5].mxu1 }
 0x315   : > { %v1187_v38 = vpop.f32.mrb[6].mxu1 }
 0x316   : > { %v673_v39 = vpack.c.bf16 %v1187_v38, %v1186_v36  ;;  %v626_v40 = vpop.f32.mrb[7].mxu1 }
 0x317   : > { %v672_v41 = vpack.c.bf16 %v626_v40, %v623_v37  ;;  %v830_v44 = vld [vmem:[#allocation3 + $0x8] sm:$0xff] }
 0x318   : > { %v829_v42 = vld [vmem:[#allocation3] sm:$0xff]  ;;  %681 = vst.msk [vmem:[#allocation3 + $0x18] sm:$0xff] %vm431_vm1, %v673_v39 }
 0x319   : > { %1223 = vmatpush3.bf16.msra.mxu1 %v829_v42  ;;  %680 = vst.msk [vmem:[#allocation3 + $0x10] sm:$0xff] %vm431_vm1, %v672_v41 }
 0x31a   : > { %1224 = vmatprep.subr.bf16.mxu1 %v1590_v0 }
 0x31b   : > { %v1190_v43 = vpop.f32.mrb[8].mxu1 }
 0x31c   : > { %v639_v45 = vpop.f32.mrb[9].mxu1 }
 0x31d   : > { %1225 = vmatpush3.bf16.msra.mxu1 %v830_v44  ;;  %v1191_v46 = vpop.f32.mrb[10].mxu1 }
 0x31e   : > { %v675_v47 = vpack.c.bf16 %v1191_v46, %v1190_v43  ;;  %v642_v48 = vpop.f32.mrb[11].mxu1  ;;  %1226 = vmatprep.subr.bf16.mxu1 %v1590_v0 }
 0x31f   : > { %v674_v49 = vpack.c.bf16 %v642_v48, %v639_v45  ;;  %v832_v51 = vld [vmem:[#allocation3 + $0x18] sm:$0xff] }
 0x320   : > { %683 = vst.msk [vmem:[#allocation3 + $0x28] sm:$0xff] %vm431_vm1, %v675_v47  ;;  %v831_v50 = vld [vmem:[#allocation3 + $0x10] sm:$0xff] }
 0x321   : > { %682 = vst.msk [vmem:[#allocation3 + $0x20] sm:$0xff] %vm431_vm1, %v674_v49  ;;  %1227 = vmatpush3.bf16.msra.mxu1 %v831_v50 }
 0x322   : > { %1228 = vmatprep.subr.bf16.mxu1 %v1590_v0 }
 0x323   : > { %v1194_v52 = vpop.f32.mrb[12].mxu1 }
 0x324   : > { %v655_v53 = vpop.f32.mrb[13].mxu1 }
 0x325   : > { %v1195_v54 = vpop.f32.mrb[14].mxu1  ;;  %1229 = vmatpush3.bf16.msra.mxu1 %v832_v51 }
 0x326   : > { %v677_v55 = vpack.c.bf16 %v1195_v54, %v1194_v52  ;;  %v658_v56 = vpop.f32.mrb[15].mxu1  ;;  %1230 = vmatprep.subr.bf16.mxu1 %v1590_v0 }
 0x327   : > { %v676_v58 = vpack.c.bf16 %v658_v56, %v655_v53  ;;  %v834_v60 = vld [vmem:[#allocation3 + $0x28] sm:$0xff] }
 0x328   : > { %685 = vst.msk [vmem:[#allocation3 + $0x38] sm:$0xff] %vm431_vm1, %v677_v55  ;;  %v833_v59 = vld [vmem:[#allocation3 + $0x20] sm:$0xff] }
 0x329   : > { %684 = vst.msk [vmem:[#allocation3 + $0x30] sm:$0xff] %vm431_vm1, %v676_v58  ;;  %1231 = vmatpush3.bf16.msra.mxu1 %v833_v59 }
 0x32a   : > { %1232 = vmatprep.subr.bf16.mxu1 %v1590_v0 }
 0x32d   : > { %1233 = vmatpush3.bf16.msra.mxu1 %v834_v60 }
 0x32e   : > { %1234 = vmatprep.subr.bf16.mxu1 %v1590_v0 }
 0x32f   : > { %v836_v62 = vld [vmem:[#allocation3 + $0x38] sm:$0xff] }
 0x330   : > { %v835_v61 = vld [vmem:[#allocation3 + $0x30] sm:$0xff] }
 0x331   : > { %1235 = vmatpush3.bf16.msra.mxu1 %v835_v61 }
 0x332   : > { %1236 = vmatprep.subr.bf16.mxu1 %v1590_v0 }
 0x335   : > { %1237 = vmatpush3.bf16.msra.mxu1 %v836_v62 }
 0x34b   : > { %v750_v63 = vpop.f32.mrb[16].mxu1 }
 0x34c   : > { %v1214_v1 = vpop.f32.mrb[17].mxu1  ;;  %v764_v2 = vsel %vm506_vm3, %v750_v63, -1e+30 }
 0x34d   : > { %765 = vmax.xlane.f32.xlu1 %v764_v2  ;;  %v753_v3 = vpop.f32.mrb[18].mxu1  ;;  %v767_v7 = vsub.f32 %v764_v2, %v760_v6 }
 0x34e   : > { %v1215_v4 = vpop.f32.mrb[19].mxu1 }
 0x3da   : > { %v766_v8 = vpop.xlane.xlu1 %765 }
 0x3db   : > { %v768_v9 = vsub.f32 %v767_v7, %v766_v8 }
 0x3dd   : > { %v769_v11 = vmul.f32 1.442695, %v768_v9 }
 0x3df   : > { %1338 = vpow2.f32 %v769_v11 }
 0x3e9   : > { %v1339_v0 = vpop.eup %1338 }
 0x3ea   : > { %v771_v12 = vadd.f32 0.0001, %v1339_v0 }
 0x3ec   : > { %v772_v13 = vmul.f32 0.09534626, %v771_v12 }
 0x3ee   : > { %v1108_v14 = vpack.c.bf16 %v772_v13, %v772_v13  ;;  %v773_v15 = vsel %vm506_vm3, %v772_v13, 0.0 }
 0x3ef   : > { %v825_v18 = vmul.f32 %v1110_v17, %v773_v15 }
 0x3f0   : > { %1219 = vmatmul.mubr.msk.bf16.vlgmr.msra.gmra.mrb[4].mxu0 %vm1107_vm5, %v1108_v14  ;;  %1239 = vmatmul.mubr.msk.bf16.vlgmr.msra.gmra.mrb[20].mxu1 %vm1107_vm5, %v1108_v14 }
 0x3f1   : > { %826 = vadd.xlane.f32.xlu1 %v825_v18 }
 0x47e   : > { %v827_v19 = vpop.xlane.xlu1 %826 }
 0x47f   : > { %1340 = vrcp.f32 %v827_v19 }
 0x489   : > { %v1341_v57 = vpop.eup %1340 }
 0x4c3   : > { %v810_v20 = vpop.f32.mrb[4].mxu0  ;;  %v871_v21 = vpop.f32.mrb[20].mxu1 }
 0x4c4   : > { %817 = vst.msk [vmem:[%s383_s15] sm:$0xff] %vm544_vm4, %v810_v20  ;;  %v877_v22 = vmul.f32 %v1341_v57, %v871_v21  ;;  %v1220_v24 = vpop.f32.mrb[5].mxu0  ;;  %v1240_v25 = vpop.f32.mrb[21].mxu1 }
 0x4c5   : > { %v813_v26 = vpop.f32.mrb[6].mxu0  ;;  %v874_v27 = vpop.f32.mrb[22].mxu1 }
 0x4c6   : > { %1473 = shalt.err (!%p1470_p12)
}
 0x4c7   : > { %s1474_s10 = scalar_lea.hbm %s1994_s21, 128  ;;  %s1478_s23 = scalar_lea.hbm %s2082_s6, 256 }
 0x4c8   : > { %p1475_p0 = scmp.ne.s32.totalorder %s1994_s21, %s1474_s10  ;;  %p1479_p9 = scmp.lt.u32.totalorder %s1994_s21, %s2082_s6 }
 0x4c9   : > { %p1480_p4 = scmp.lt.u32.totalorder %s1478_s23, %s1474_s10  ;;  %p1482_p5 = scmp.lt.u32.totalorder %s1474_s10, %s1994_s21 }
 0x4ca   : > { %p1476_p11 = pnand %p1475_p0, %p2130_p10 }
 0x4cb   : > { %p1481_p2 = por %p1480_p4, %p1479_p9 }
 0x4cc   : > { %p1477_p1 = pneg %p1476_p11 }
 0x4cd   : > { %p1483_p13 = por %p1482_p5, %p1481_p2 }
 0x4cf   : > { %p1484_p7 = pnand %p1483_p13, %p1477_p1 }
 0x4d1   : > { %1487 = shalt.err (!%p1484_p7)
}
 0x4d2   : > { %1254 = dma.vmem_to_hbm [thread:$0]  (%p2130_p10), %s1996_s0, 128, %s1994_s21, %s885_s9   ;;  %v1221_v28 = vpop.f32.mrb[7].mxu0  ;;  %v1241_v30 = vpop.f32.mrb[23].mxu1  ;;  %878 = vst.msk [vmem:[%s376_s27] sm:$0xff] %vm431_vm1, %v877_v22 }
 0x4d3   : > { %s880_s15 = scalar_lea.sflag [#allocation8], %s1853_s20  ;;  %s1488_s11 = scalar_lea.vmem %s2004_s28, 128 }
 0x4d4   : > { %p1489_p3 = scmp.ne.s32.totalorder %s2004_s28, %s1488_s11  ;;  %s1593_s13 = smov [#allocation14]  }
 0x4d5   : > { %s1492_s26 = sshll.u32 %s1593_s13, 4  ;;  %s1493_s26 = int_to_ptr.vmem [resolvable:$false] %s1492_s26 }
 0x4d6   : > { %p1490_p6 = pnand %p1489_p3, %p2130_p10  ;;  %s1494_s22 = scalar_lea.vmem %s1493_s26, 256 }
 0x4d7   : > { %p1495_p12 = scmp.lt.s32.totalorder %s2004_s28, %s1493_s26  ;;  %p1496_p0 = scmp.lt.s32.totalorder %s1494_s22, %s1488_s11 }
 0x4d8   : > { %p1491_p8 = pneg %p1490_p6 }
 0x4d9   : > { %p1497_p11 = por %p1496_p0, %p1495_p12 }
 0x4db   : > { %p1498_p1 = pnand %p1497_p11, %p1491_p8 }
 0x4dd   : > { %1501 = shalt.err (!%p1498_p1)
}
 0x4de   : > { %s1502_s20 = scalar_lea.hbm %s2002_s8, 128  ;;  %s1506_s27 = scalar_lea.hbm %s2129_s16, 256 }
 0x4df   : > { %p1503_p9 = scmp.ne.s32.totalorder %s2002_s8, %s1502_s20  ;;  %p1507_p5 = scmp.lt.u32.totalorder %s2002_s8, %s2129_s16 }
 0x4e0   : > { %p1508_p13 = scmp.lt.u32.totalorder %s1506_s27, %s1502_s20  ;;  %p1510_p3 = scmp.lt.u32.totalorder %s1502_s20, %s2002_s8 }
 0x4e1   : > { %p1504_p4 = pnand %p1503_p9, %p2130_p10 }
 0x4e2   : > { %p1509_p7 = por %p1508_p13, %p1507_p5 }
 0x4e3   : > { %p1505_p2 = pneg %p1504_p4 }
 0x4e4   : > { %p1511_p6 = por %p1510_p3, %p1509_p7 }
 0x4e6   : > { %p1512_p8 = pnand %p1511_p6, %p1505_p2 }
 0x4e8   : > { %1515 = shalt.err (!%p1512_p8)
}
 0x4e9   : > { %1253 = dma.vmem_to_hbm [thread:$0]  (%p2130_p10), %s2004_s28, 128, %s2002_s8, %s880_s15  }
 0x4ea PF: > { %s2131_s7 = sld [smem:[#allocation22_spill]]  ;;  %s2132_s12 = sld [smem:[#allocation28_spill]] }
 0x4eb   : > { %s2133_s14 = sld [smem:[#allocation24_spill]] }
 0x4f0   : > { %s925_s5 = sand.u32 1, %s2131_s7   ;;  %p2134_p12 = scmp.ne.s32.totalorder %s2132_s12, 0 }
 0x4f1   : > { %p2135_p0 = scmp.ge.s32.totalorder %s2133_s14, 2  ;;  %s926_s10 = scalar_lea.sflag [#allocation8], %s925_s5 }
 0x4f3   : > { %p1272_p11 = pnand %p2135_p0, %p2134_p12 }
 0x4f5   : > { %1553 = dma.done.wait (!%p1272_p11), %s926_s10, 128  }
 0x4f6   : > { %1555 = vsyncadd (!%p1272_p11), %s926_s10, 4294967168  ;;  %s935_s18 = scalar_lea.sflag [#allocation16], %s925_s5 }
 0x4f7   : > { %1557 = dma.done.wait (!%p1272_p11), %s935_s18, 128  }
 0x4f8   : > { %1559 = vsyncadd (!%p1272_p11), %s935_s18, 4294967168  ;;  %s31_s0 = sadd.s32 1, %s2133_s14   ;;  %s2136_s28 = sld [smem:[#allocation26_spill]] }
 0x4f9   : > { %p28_p1 = scmp.ge.s32.totalorder %s31_s0, 4   ;;  %s2137_s26 = sld [smem:[#allocation23_spill]] }
 0x4fa   : > { %s2138_s27 = sld [smem:[#allocation25_spill]]  ;;  %s2139_s23 = smov %s1566_s24 }
 0x4fb   : > { %s2140_s24 = smov %s1570_s25  ;;  %30 = sbr.rel (!%p28_p1) target bundleno = 15 (0xf), region = 134 }
 0x4fe   : > { %s2141_s25 = smov %s2136_s28 }
 0x502   :  { %940 = vsyncpa [#allocation7], 1 }
 0x503   :  { %942 = vsyncpa [#allocation7 + $0x1], 1 }
 0x504   :  { %943 = vsyncpa [#allocation10], 1 }
 0x505   :  { %945 = vsyncpa [#allocation10 + $0x1], 1 }
 0x506   :  { %946 = vsyncpa [#allocation13], 1 }
 0x507   :  { %947 = vsyncpa [#allocation8], 1 }
 0x508   :  { %949 = vsyncpa [#allocation8 + $0x1], 1 }
 0x509   :  { %950 = vsyncpa [#allocation16], 1 }
 0x50a   :  { %952 = vsyncpa [#allocation16 + $0x1], 1 }

</bundles_post_ra>
